<compile_context>
chip_gen: v7x
topology: tpu7x:2x2x1
jax: 0.10.0
libtpu: 0.0.40
codegen_flags: <defaults>
</compile_context>

<pallas_src>
import jax
import jax.numpy as jnp
from jax.experimental import pallas as pl
from jax.experimental.pallas import tpu as pltpu


def metric_block(x, w, b, gamma, beta):
    """x: (N, Cin, D, H, W) float32 (PyTorch NCDHW). Returns (N, Cout, D, H, W)."""
    N, Cin, D, H, W = x.shape
    Cout = w.shape[0]
    rows = N * D * H * W
    LANES = 128
    Cp = max(pl.cdiv(Cout, LANES) * LANES, LANES)      # lane-dense Cout
    K = 27 * Cin
    Kp = pl.cdiv(K, LANES) * LANES                     # lane-aligned im2col K

    # Row tile for the in-kernel matmul/stats/affine passes.
    if rows >= 256:
        ROW_TILE = 256
    else:
        ROW_TILE = ((rows + 15) // 16) * 16            # bf16 sublane-pack friendly
    rows_p = pl.cdiv(rows, ROW_TILE) * ROW_TILE
    n_tiles = rows_p // ROW_TILE

    # ---- layout plumbing (XLA, done once): NCDHW -> NDHWC im2col in bf16 ----
    xt = jnp.transpose(x, (0, 2, 3, 4, 1)).astype(jnp.bfloat16)       # NDHWC
    xp = jnp.pad(xt, ((0, 0), (1, 1), (1, 1), (1, 1), (0, 0)))
    taps = [
        xp[:, kd:kd + D, kh:kh + H, kw:kw + W, :]
        for kd in range(3) for kh in range(3) for kw in range(3)
    ]
    if Kp > K:  # fold the K zero-pad into the concat (no second full-slab pass)
        taps.append(jnp.zeros((N, D, H, W, Kp - K), jnp.bfloat16))
    im2col = jnp.concatenate(taps, axis=-1).reshape(rows, Kp)         # (rows, Kp)
    if rows_p > rows:  # padded rows are all-zero -> contribute 0 to BN sums
        im2col = jnp.pad(im2col, ((0, rows_p - rows), (0, 0)))

    # weights: (Cout, Cin, 3,3,3) -> (kd,kh,kw,Cin,Cout) -> (Kp, Cp) bf16
    wk = jnp.transpose(w, (2, 3, 4, 1, 0)).reshape(K, Cout)
    wk = jnp.pad(wk, ((0, Kp - K), (0, Cp - Cout))).astype(jnp.bfloat16)

    # Conv bias unused: training-mode BN subtracts the batch mean, which
    # exactly cancels a per-channel constant bias in the forward output.
    del b

    # gamma/beta packed into a single (2, Cp) f32 input (padded lanes -> 0 out).
    gb = jnp.stack([
        jnp.pad(gamma.astype(jnp.float32), (0, Cp - Cout)),
        jnp.pad(beta.astype(jnp.float32), (0, Cp - Cout)),
    ], axis=0)

    def kernel(x_ref, w_ref, gb_ref, o_ref, acc_ref):
        # x_ref:   (rows_p, Kp)  bf16 im2col activations
        # w_ref:   (Kp, Cp)      bf16 conv weights
        # gb_ref:  (2, Cp)       f32  BN gamma / beta
        # o_ref:   (rows_p, Cp)  f32  lane-dense output slab
        # acc_ref: (rows_p, Cp)  f32  VMEM scratch holding conv results
        wv = w_ref[...]
        inv_rows = jnp.float32(1.0 / rows)  # divide by TRUE rows (pad rows are 0)

        # ---- pass 1: row-tiled MXU matmul + single-traversal BN statistics ----
        def stat_body(t, carry):
            s1, s2 = carry
            r = pl.multiple_of(t * ROW_TILE, ROW_TILE)
            a = jnp.dot(x_ref[pl.ds(r, ROW_TILE), :], wv,
                        preferred_element_type=jnp.float32)           # f32 acc
            acc_ref[pl.ds(r, ROW_TILE), :] = a
            return (s1 + jnp.sum(a, axis=0, keepdims=True),
                    s2 + jnp.sum(a * a, axis=0, keepdims=True))

        zeros = jnp.zeros((1, Cp), jnp.float32)
        s1, s2 = jax.lax.fori_loop(0, n_tiles, stat_body, (zeros, zeros),
                                   unroll=(n_tiles <= 8))

        # ---- BatchNorm3d (training-mode batch stats, biased variance) ----
        mean = s1 * inv_rows
        var = s2 * inv_rows - mean * mean
        gbv = gb_ref[...]
        scale = gbv[0:1, :] * jax.lax.rsqrt(var + 1e-5)                # (1, Cp)
        shift = gbv[1:2, :] - mean * scale                             # (1, Cp)

        # ---- pass 2: fused per-channel affine + LeakyReLU(0.2) ----
        def out_body(t, _):
            r = pl.multiple_of(t * ROW_TILE, ROW_TILE)
            y = acc_ref[pl.ds(r, ROW_TILE), :] * scale + shift
            o_ref[pl.ds(r, ROW_TILE), :] = jnp.maximum(y, 0.2 * y)
            return 0

        jax.lax.fori_loop(0, n_tiles, out_body, 0, unroll=(n_tiles <= 8))

    vmem = pl.BlockSpec(memory_space=pltpu.MemorySpace.VMEM)
    out2d = pl.pallas_call(
        kernel,
        out_shape=jax.ShapeDtypeStruct((rows_p, Cp), jnp.float32),
        in_specs=[vmem, vmem, vmem],
        out_specs=vmem,
        scratch_shapes=[pltpu.VMEM((rows_p, Cp), jnp.float32)],
    )(im2col, wk, gb)

    # Single fused slice + reshape + transpose back to NCDHW (one slab read).
    out = jnp.transpose(out2d[:rows, :Cout].reshape(N, D, H, W, Cout),
                        (0, 4, 1, 2, 3))
    return out


if __name__ == "__main__":
    # Small shapes consistent with the module: batch=2, in_channel=4,
    # out_channel=8, spatial D=H=W=8.
    N, Cin, Cout, D, H, W = 2, 4, 8, 8, 8, 8

    key = jax.random.PRNGKey(0)
    kx, kw, kb = jax.random.split(key, 3)

    x = jax.random.normal(kx, (N, Cin, D, H, W), dtype=jnp.float32)

    # Deterministic parameter init (synthetic; shapes match nn.Conv3d/BatchNorm3d).
    w = 0.1 * jax.random.normal(kw, (Cout, Cin, 3, 3, 3), dtype=jnp.float32)
    b = 0.1 * jax.random.normal(kb, (Cout,), dtype=jnp.float32)
    gamma = jnp.ones((Cout,), dtype=jnp.float32)   # BatchNorm3d default weight
    beta = jnp.zeros((Cout,), dtype=jnp.float32)   # BatchNorm3d default bias

    out = metric_block(x, w, b, gamma, beta)
    jax.block_until_ready(out)
    assert out.shape == (N, Cout, D, H, W)
    assert bool(jnp.all(jnp.isfinite(out)))
    print("KERNEL_OK")
</pallas_src>

<mosaic_0001>
module attributes {stable_mosaic.version = 11 : i64} {
  func.func @kernel(%arg0: memref<1024x128xbf16, #tpu.memory_space<vmem>>, %arg1: memref<128x128xbf16, #tpu.memory_space<vmem>>, %arg2: memref<2x128xf32, #tpu.memory_space<vmem>>, %arg3: memref<1024x128xf32, #tpu.memory_space<vmem>>, %arg4: memref<1024x128xf32, #tpu.memory_space<vmem>>) attributes {dimension_semantics = [], scalar_prefetch = 0 : i64, scratch_operands = 1 : i64, tpu.core_type = #tpu.core_type<tc>} {
    %c0 = arith.constant 0 : index
    %c0_0 = arith.constant 0 : index
    %0 = vector.load %arg1[%c0, %c0_0] : memref<128x128xbf16, #tpu.memory_space<vmem>>, vector<128x128xbf16>
    %cst = arith.constant 0.000000e+00 : f32
    %1 = vector.broadcast %cst : f32 to vector<1x128xf32>
    %c0_i32 = arith.constant 0 : i32
    %c256_i32 = arith.constant 256 : i32
    %2 = arith.muli %c0_i32, %c256_i32 : i32
    %3 = tpu.assume_multiple %2, 256 : i32
    %4 = arith.index_cast %3 : i32 to index
    %c0_1 = arith.constant 0 : index
    %5 = vector.load %arg0[%4, %c0_1] : memref<1024x128xbf16, #tpu.memory_space<vmem>>, vector<256x128xbf16>
    %cst_2 = arith.constant dense<0.000000e+00> : vector<256x128xf32>
    %6 = tpu.matmul %5, %0, %cst_2 {dimension_numbers = #tpu.dot_dimension_numbers<[1], [0], [0], [1], [0, 0, 1, 1], [], []>} : vector<256x128xbf16>, vector<128x128xbf16>, vector<256x128xf32> -> vector<256x128xf32>
    %7 = arith.index_cast %3 : i32 to index
    %c0_3 = arith.constant 0 : index
    %8 = vector.load %arg4[%7, %c0_3] : memref<1024x128xf32, #tpu.memory_space<vmem>>, vector<256x128xf32>
    tpu.vector_store %arg4[%7, %c0_3], %6 {strides = array<i32>} : memref<1024x128xf32, #tpu.memory_space<vmem>>, vector<256x128xf32>,
    %cst_4 = arith.constant dense<0.000000e+00> : vector<128xf32>
    %9 = vector.multi_reduction <add>, %6, %cst_4 [0] : vector<256x128xf32> to vector<128xf32>
    %10 = vector.shape_cast %9 : vector<128xf32> to vector<1x128xf32>
    %11 = arith.addf %1, %10 : vector<1x128xf32>
    %12 = arith.mulf %6, %6 : vector<256x128xf32>
    %cst_5 = arith.constant dense<0.000000e+00> : vector<128xf32>
    %13 = vector.multi_reduction <add>, %12, %cst_5 [0] : vector<256x128xf32> to vector<128xf32>
    %14 = vector.shape_cast %13 : vector<128xf32> to vector<1x128xf32>
    %15 = arith.addf %1, %14 : vector<1x128xf32>
    %c1_i32 = arith.constant 1 : i32
    %c256_i32_6 = arith.constant 256 : i32
    %16 = arith.muli %c1_i32, %c256_i32_6 : i32
    %17 = tpu.assume_multiple %16, 256 : i32
    %18 = arith.index_cast %17 : i32 to index
    %c0_7 = arith.constant 0 : index
    %19 = vector.load %arg0[%18, %c0_7] : memref<1024x128xbf16, #tpu.memory_space<vmem>>, vector<256x128xbf16>
    %cst_8 = arith.constant dense<0.000000e+00> : vector<256x128xf32>
    %20 = tpu.matmul %19, %0, %cst_8 {dimension_numbers = #tpu.dot_dimension_numbers<[1], [0], [0], [1], [0, 0, 1, 1], [], []>} : vector<256x128xbf16>, vector<128x128xbf16>, vector<256x128xf32> -> vector<256x128xf32>
    %21 = arith.index_cast %17 : i32 to index
    %c0_9 = arith.constant 0 : index
    %22 = vector.load %arg4[%21, %c0_9] : memref<1024x128xf32, #tpu.memory_space<vmem>>, vector<256x128xf32>
    tpu.vector_store %arg4[%21, %c0_9], %20 {strides = array<i32>} : memref<1024x128xf32, #tpu.memory_space<vmem>>, vector<256x128xf32>,
    %cst_10 = arith.constant dense<0.000000e+00> : vector<128xf32>
    %23 = vector.multi_reduction <add>, %20, %cst_10 [0] : vector<256x128xf32> to vector<128xf32>
    %24 = vector.shape_cast %23 : vector<128xf32> to vector<1x128xf32>
    %25 = arith.addf %11, %24 : vector<1x128xf32>
    %26 = arith.mulf %20, %20 : vector<256x128xf32>
    %cst_11 = arith.constant dense<0.000000e+00> : vector<128xf32>
    %27 = vector.multi_reduction <add>, %26, %cst_11 [0] : vector<256x128xf32> to vector<128xf32>
    %28 = vector.shape_cast %27 : vector<128xf32> to vector<1x128xf32>
    %29 = arith.addf %15, %28 : vector<1x128xf32>
    %c2_i32 = arith.constant 2 : i32
    %c256_i32_12 = arith.constant 256 : i32
    %30 = arith.muli %c2_i32, %c256_i32_12 : i32
    %31 = tpu.assume_multiple %30, 256 : i32
    %32 = arith.index_cast %31 : i32 to index
    %c0_13 = arith.constant 0 : index
    %33 = vector.load %arg0[%32, %c0_13] : memref<1024x128xbf16, #tpu.memory_space<vmem>>, vector<256x128xbf16>
    %cst_14 = arith.constant dense<0.000000e+00> : vector<256x128xf32>
    %34 = tpu.matmul %33, %0, %cst_14 {dimension_numbers = #tpu.dot_dimension_numbers<[1], [0], [0], [1], [0, 0, 1, 1], [], []>} : vector<256x128xbf16>, vector<128x128xbf16>, vector<256x128xf32> -> vector<256x128xf32>
    %35 = arith.index_cast %31 : i32 to index
    %c0_15 = arith.constant 0 : index
    %36 = vector.load %arg4[%35, %c0_15] : memref<1024x128xf32, #tpu.memory_space<vmem>>, vector<256x128xf32>
    tpu.vector_store %arg4[%35, %c0_15], %34 {strides = array<i32>} : memref<1024x128xf32, #tpu.memory_space<vmem>>, vector<256x128xf32>,
    %cst_16 = arith.constant dense<0.000000e+00> : vector<128xf32>
    %37 = vector.multi_reduction <add>, %34, %cst_16 [0] : vector<256x128xf32> to vector<128xf32>
    %38 = vector.shape_cast %37 : vector<128xf32> to vector<1x128xf32>
    %39 = arith.addf %25, %38 : vector<1x128xf32>
    %40 = arith.mulf %34, %34 : vector<256x128xf32>
    %cst_17 = arith.constant dense<0.000000e+00> : vector<128xf32>
    %41 = vector.multi_reduction <add>, %40, %cst_17 [0] : vector<256x128xf32> to vector<128xf32>
    %42 = vector.shape_cast %41 : vector<128xf32> to vector<1x128xf32>
    %43 = arith.addf %29, %42 : vector<1x128xf32>
    %c3_i32 = arith.constant 3 : i32
    %c256_i32_18 = arith.constant 256 : i32
    %44 = arith.muli %c3_i32, %c256_i32_18 : i32
    %45 = tpu.assume_multiple %44, 256 : i32
    %46 = arith.index_cast %45 : i32 to index
    %c0_19 = arith.constant 0 : index
    %47 = vector.load %arg0[%46, %c0_19] : memref<1024x128xbf16, #tpu.memory_space<vmem>>, vector<256x128xbf16>
    %cst_20 = arith.constant dense<0.000000e+00> : vector<256x128xf32>
    %48 = tpu.matmul %47, %0, %cst_20 {dimension_numbers = #tpu.dot_dimension_numbers<[1], [0], [0], [1], [0, 0, 1, 1], [], []>} : vector<256x128xbf16>, vector<128x128xbf16>, vector<256x128xf32> -> vector<256x128xf32>
    %49 = arith.index_cast %45 : i32 to index
    %c0_21 = arith.constant 0 : index
    %50 = vector.load %arg4[%49, %c0_21] : memref<1024x128xf32, #tpu.memory_space<vmem>>, vector<256x128xf32>
    tpu.vector_store %arg4[%49, %c0_21], %48 {strides = array<i32>} : memref<1024x128xf32, #tpu.memory_space<vmem>>, vector<256x128xf32>,
    %cst_22 = arith.constant dense<0.000000e+00> : vector<128xf32>
    %51 = vector.multi_reduction <add>, %48, %cst_22 [0] : vector<256x128xf32> to vector<128xf32>
    %52 = vector.shape_cast %51 : vector<128xf32> to vector<1x128xf32>
    %53 = arith.addf %39, %52 : vector<1x128xf32>
    %54 = arith.mulf %48, %48 : vector<256x128xf32>
    %cst_23 = arith.constant dense<0.000000e+00> : vector<128xf32>
    %55 = vector.multi_reduction <add>, %54, %cst_23 [0] : vector<256x128xf32> to vector<128xf32>
    %56 = vector.shape_cast %55 : vector<128xf32> to vector<1x128xf32>
    %57 = arith.addf %43, %56 : vector<1x128xf32>
    %c4_i32 = arith.constant 4 : i32
    %cst_24 = arith.constant 9.765625E-4 : f32
    %58 = vector.broadcast %cst_24 : f32 to vector<1x128xf32>
    %59 = arith.mulf %53, %58 : vector<1x128xf32>
    %cst_25 = arith.constant 9.765625E-4 : f32
    %60 = vector.broadcast %cst_25 : f32 to vector<1x128xf32>
    %61 = arith.mulf %57, %60 : vector<1x128xf32>
    %62 = arith.mulf %59, %59 : vector<1x128xf32>
    %63 = arith.subf %61, %62 : vector<1x128xf32>
    %c0_26 = arith.constant 0 : index
    %c0_27 = arith.constant 0 : index
    %64 = vector.load %arg2[%c0_26, %c0_27] : memref<2x128xf32, #tpu.memory_space<vmem>>, vector<2x128xf32>
    %65 = vector.extract_strided_slice %64 {offsets = [0, 0], sizes = [1, 128], strides = [1, 1]} : vector<2x128xf32> to vector<1x128xf32>
    %cst_28 = arith.constant 9.99999974E-6 : f32
    %66 = vector.broadcast %cst_28 : f32 to vector<1x128xf32>
    %67 = arith.addf %63, %66 : vector<1x128xf32>
    %68 = math.rsqrt %67 : vector<1x128xf32>
    %69 = arith.mulf %65, %68 : vector<1x128xf32>
    %70 = vector.extract_strided_slice %64 {offsets = [1, 0], sizes = [1, 128], strides = [1, 1]} : vector<2x128xf32> to vector<1x128xf32>
    %71 = arith.mulf %59, %69 : vector<1x128xf32>
    %72 = arith.subf %70, %71 : vector<1x128xf32>
    %c0_i32_29 = arith.constant 0 : i32
    %c256_i32_30 = arith.constant 256 : i32
    %73 = arith.muli %c0_i32_29, %c256_i32_30 : i32
    %74 = tpu.assume_multiple %73, 256 : i32
    %75 = arith.index_cast %74 : i32 to index
    %c0_31 = arith.constant 0 : index
    %76 = vector.load %arg4[%75, %c0_31] : memref<1024x128xf32, #tpu.memory_space<vmem>>, vector<256x128xf32>
    %77 = vector.broadcast %69 : vector<1x128xf32> to vector<256x128xf32>
    %78 = arith.mulf %76, %77 : vector<256x128xf32>
    %79 = vector.broadcast %72 : vector<1x128xf32> to vector<256x128xf32>
    %80 = arith.addf %78, %79 : vector<256x128xf32>
    %cst_32 = arith.constant 2.000000e-01 : f32
    %81 = vector.broadcast %cst_32 : f32 to vector<256x128xf32>
    %82 = arith.mulf %81, %80 : vector<256x128xf32>
    %83 = arith.maximumf %80, %82 : vector<256x128xf32>
    %84 = arith.index_cast %74 : i32 to index
    %c0_33 = arith.constant 0 : index
    %85 = vector.load %arg3[%84, %c0_33] : memref<1024x128xf32, #tpu.memory_space<vmem>>, vector<256x128xf32>
    tpu.vector_store %arg3[%84, %c0_33], %83 {strides = array<i32>} : memref<1024x128xf32, #tpu.memory_space<vmem>>, vector<256x128xf32>,
    %c1_i32_34 = arith.constant 1 : i32
    %c256_i32_35 = arith.constant 256 : i32
    %86 = arith.muli %c1_i32_34, %c256_i32_35 : i32
    %87 = tpu.assume_multiple %86, 256 : i32
    %88 = arith.index_cast %87 : i32 to index
    %c0_36 = arith.constant 0 : index
    %89 = vector.load %arg4[%88, %c0_36] : memref<1024x128xf32, #tpu.memory_space<vmem>>, vector<256x128xf32>
    %90 = vector.broadcast %69 : vector<1x128xf32> to vector<256x128xf32>
    %91 = arith.mulf %89, %90 : vector<256x128xf32>
    %92 = vector.broadcast %72 : vector<1x128xf32> to vector<256x128xf32>
    %93 = arith.addf %91, %92 : vector<256x128xf32>
    %cst_37 = arith.constant 2.000000e-01 : f32
    %94 = vector.broadcast %cst_37 : f32 to vector<256x128xf32>
    %95 = arith.mulf %94, %93 : vector<256x128xf32>
    %96 = arith.maximumf %93, %95 : vector<256x128xf32>
    %97 = arith.index_cast %87 : i32 to index
    %c0_38 = arith.constant 0 : index
    %98 = vector.load %arg3[%97, %c0_38] : memref<1024x128xf32, #tpu.memory_space<vmem>>, vector<256x128xf32>
    tpu.vector_store %arg3[%97, %c0_38], %96 {strides = array<i32>} : memref<1024x128xf32, #tpu.memory_space<vmem>>, vector<256x128xf32>,
    %c2_i32_39 = arith.constant 2 : i32
    %c256_i32_40 = arith.constant 256 : i32
    %99 = arith.muli %c2_i32_39, %c256_i32_40 : i32
    %100 = tpu.assume_multiple %99, 256 : i32
    %101 = arith.index_cast %100 : i32 to index
    %c0_41 = arith.constant 0 : index
    %102 = vector.load %arg4[%101, %c0_41] : memref<1024x128xf32, #tpu.memory_space<vmem>>, vector<256x128xf32>
    %103 = vector.broadcast %69 : vector<1x128xf32> to vector<256x128xf32>
    %104 = arith.mulf %102, %103 : vector<256x128xf32>
    %105 = vector.broadcast %72 : vector<1x128xf32> to vector<256x128xf32>
    %106 = arith.addf %104, %105 : vector<256x128xf32>
    %cst_42 = arith.constant 2.000000e-01 : f32
    %107 = vector.broadcast %cst_42 : f32 to vector<256x128xf32>
    %108 = arith.mulf %107, %106 : vector<256x128xf32>
    %109 = arith.maximumf %106, %108 : vector<256x128xf32>
    %110 = arith.index_cast %100 : i32 to index
    %c0_43 = arith.constant 0 : index
    %111 = vector.load %arg3[%110, %c0_43] : memref<1024x128xf32, #tpu.memory_space<vmem>>, vector<256x128xf32>
    tpu.vector_store %arg3[%110, %c0_43], %109 {strides = array<i32>} : memref<1024x128xf32, #tpu.memory_space<vmem>>, vector<256x128xf32>,
    %c3_i32_44 = arith.constant 3 : i32
    %c256_i32_45 = arith.constant 256 : i32
    %112 = arith.muli %c3_i32_44, %c256_i32_45 : i32
    %113 = tpu.assume_multiple %112, 256 : i32
    %114 = arith.index_cast %113 : i32 to index
    %c0_46 = arith.constant 0 : index
    %115 = vector.load %arg4[%114, %c0_46] : memref<1024x128xf32, #tpu.memory_space<vmem>>, vector<256x128xf32>
    %116 = vector.broadcast %69 : vector<1x128xf32> to vector<256x128xf32>
    %117 = arith.mulf %115, %116 : vector<256x128xf32>
    %118 = vector.broadcast %72 : vector<1x128xf32> to vector<256x128xf32>
    %119 = arith.addf %117, %118 : vector<256x128xf32>
    %cst_47 = arith.constant 2.000000e-01 : f32
    %120 = vector.broadcast %cst_47 : f32 to vector<256x128xf32>
    %121 = arith.mulf %120, %119 : vector<256x128xf32>
    %122 = arith.maximumf %119, %121 : vector<256x128xf32>
    %123 = arith.index_cast %113 : i32 to index
    %c0_48 = arith.constant 0 : index
    %124 = vector.load %arg3[%123, %c0_48] : memref<1024x128xf32, #tpu.memory_space<vmem>>, vector<256x128xf32>
    tpu.vector_store %arg3[%123, %c0_48], %122 {strides = array<i32>} : memref<1024x128xf32, #tpu.memory_space<vmem>>, vector<256x128xf32>,
    %c4_i32_49 = arith.constant 4 : i32
    return
  }
}

</mosaic_0001>

<bundles_post_ra>
// kernel: tpu_custom_call.1
= control target key start
LH: loop header
LB: loop body
LE: loop exit
PB: predicated region body
PF: predicated region fallthrough
CT: control target
= control target key end

     0   :  { %8 = vsyncpa [#allocation4], 0  ;;  %s5157_s0 = inlined_call_operand.hbm [shape: bf16[1024,128], index: 0, kind: input, shape index: {}]   ;;  %s5158_s1 = inlined_call_operand.hbm [shape: bf16[128,128], index: 1, kind: input, shape index: {}]   ;;  %s5159_s2 = inlined_call_operand.vmem [shape: f32[2,128], index: 2, kind: input, shape index: {}]   ;;  %s5160_s3 = inlined_call_operand.hbm [shape: f32[1024,128], index: 3, kind: output, shape index: {}]  }
   0x1   :  { %9 = vsyncpa [#allocation7], 0 }
   0x2   :  { %10 = vsyncpa [#allocation5], 0  ;;  %s3153_s12 = smov [#allocation3]   ;;  %s3081_s16 = scalar_lea.hbm %s5157_s0, 8192 }
   0x3   :  { %s16_s13 = sshll.u32 %s3153_s12, 4  ;;  %p3082_p0 = scmp.ne.s32.totalorder %s5157_s0, %s3081_s16  ;;  %s17_s13 = int_to_ptr.vmem [resolvable:$true] %s16_s13 }
   0x4   :  { %p3085_p1 = scmp.lt.u32.totalorder %s3081_s16, %s5157_s0 }
   0x6   :  { %p3087_p2 = pnand %p3085_p1, %p3082_p0 }
   0x8   :  { %3090 = shalt.err (!%p3087_p2)
}
   0x9   :  { %s3091_s21 = scalar_lea.vmem %s17_s13, 8192  ;;  %p3096_p4 = scmp.lt.s32.totalorder %s17_s13, %s17_s13 }
   0xa   :  { %p3092_p3 = scmp.ne.s32.totalorder %s17_s13, %s3091_s21  ;;  %p3097_p5 = scmp.lt.s32.totalorder %s3091_s21, %s3091_s21 }
   0xc   :  { %p3098_p6 = por %p3097_p5, %p3096_p4 }
   0xe   :  { %p3099_p7 = pnand %p3098_p6, %p3092_p3 }
  0x10   :  { %3102 = shalt.err (!%p3099_p7)
}
  0x11   :  { %s3154_s22 = smov 64   ;;  %s3155_s23 = smov 4  }
  0x12   :  { %22 = dma.hbm_to_vmem [thread:$0]  %s5157_s0, 8192, %s17_s13, [#allocation4], %s3154_s22, %s3154_s22, %s3155_s23  }
  0x13   :  { %s3156_s26 = smov [#allocation6]   ;;  %s3103_s30 = scalar_lea.hbm %s5158_s1, 1024 }
  0x14   :  { %s28_s27 = sshll.u32 %s3156_s26, 4  ;;  %p3104_p8 = scmp.ne.s32.totalorder %s5158_s1, %s3103_s30  ;;  %s29_s27 = int_to_ptr.vmem [resolvable:$true] %s28_s27 }
  0x15   :  { %p3107_p9 = scmp.lt.u32.totalorder %s3103_s30, %s5158_s1 }
  0x17   :  { %p3109_p10 = pnand %p3107_p9, %p3104_p8 }
  0x19   :  { %3112 = shalt.err (!%p3109_p10)
}
  0x1a   :  { %s3113_s8 = scalar_lea.vmem %s29_s27, 1024  ;;  %p3118_p12 = scmp.lt.s32.totalorder %s29_s27, %s29_s27 }
  0x1b   :  { %p3114_p11 = scmp.ne.s32.totalorder %s29_s27, %s3113_s8  ;;  %p3119_p13 = scmp.lt.s32.totalorder %s3113_s8, %s3113_s8 }
  0x1d   :  { %p3120_p0 = por %p3119_p13, %p3118_p12 }
  0x1f   :  { %p3121_p1 = pnand %p3120_p0, %p3114_p11 }
  0x21   :  { %3124 = shalt.err (!%p3121_p1)
}
  0x22   :  { %34 = dma.hbm_to_vmem [thread:$0]  %s5158_s1, 1024, %s29_s27, [#allocation7], %s3154_s22, %s3154_s22, %s3155_s23  }
  0x23   :  { %3147 = dma.done.wait [#allocation4], 8192  }
  0x24   :  { %3148 = vsyncadd [#allocation4], 4294959104 }
  0x25   :  { %3149 = dma.done.wait [#allocation7], 1024  }
  0x26   :  { %3150 = vsyncadd [#allocation7], 4294966272  ;;  %v3007_v0 = vld [vmem:[#allocation6] sm:$0xff]   ;;  %v3008_v1 = vld [vmem:[#allocation6 + $0x8] sm:$0xff]  }
  0x27   :  { %2808 = vmatprep.subr.bf16.mxu0 %v3007_v0  ;;  %2856 = vmatprep.subr.bf16.mxu1 %v3007_v0  ;;  %v3204_v2 = vld [vmem:[#allocation6 + $0x10] sm:$0xff]   ;;  %v3206_v3 = vld [vmem:[#allocation6 + $0x18] sm:$0xff]   ;;  %v3015_v4 = vld [vmem:[#allocation3] sm:$0xff]  }
  0x28   :  { %2809 = vmatpush3.bf16.msra.mxu0 %v3007_v0  ;;  %2857 = vmatpush3.bf16.msra.mxu1 %v3007_v0  ;;  %v3016_v5 = vld [vmem:[#allocation3 + $0x80] sm:$0xff]   ;;  %v3220_v7 = vld [vmem:[#allocation6 + $0x28] sm:$0xff]   ;;  %v3226_v8 = vld [vmem:[#allocation6 + $0x30] sm:$0xff]  }
  0x29   :  { %2810 = vmatprep.subr.bf16.mxu0 %v3008_v1  ;;  %2858 = vmatprep.subr.bf16.mxu1 %v3008_v1  ;;  %v3214_v6 = vld [vmem:[#allocation6 + $0x20] sm:$0xff]   ;;  %v3232_v9 = vld [vmem:[#allocation6 + $0x38] sm:$0xff]   ;;  %v3017_v10 = vld [vmem:[#allocation3 + $0x8] sm:$0xff]  }
  0x2a   :  { %2824 = vmatprep.mubr.bf16.mxu0 %v3015_v4  ;;  %2872 = vmatprep.mubr.bf16.mxu1 %v3016_v5  ;;  %v3018_v11 = vld [vmem:[#allocation3 + $0x88] sm:$0xff]   ;;  %v3019_v12 = vld [vmem:[#allocation3 + $0x10] sm:$0xff]   ;;  %v3021_v14 = vld [vmem:[#allocation3 + $0x18] sm:$0xff]  }
  0x2b   :  { %v3020_v13 = vld [vmem:[#allocation3 + $0x90] sm:$0xff]   ;;  %v3022_v15 = vld [vmem:[#allocation3 + $0x98] sm:$0xff]   ;;  %v3023_v16 = vld [vmem:[#allocation3 + $0x20] sm:$0xff]  }
  0x2c   :  { %2811 = vmatpush3.bf16.msra.mxu0 %v3008_v1  ;;  %2859 = vmatpush3.bf16.msra.mxu1 %v3008_v1  ;;  %v3024_v17 = vld [vmem:[#allocation3 + $0xa0] sm:$0xff]   ;;  %v3025_v18 = vld [vmem:[#allocation3 + $0x28] sm:$0xff]   ;;  %v3027_v20 = vld [vmem:[#allocation3 + $0x30] sm:$0xff]  }
  0x2d   :  { %2812 = vmatprep.subr.bf16.mxu0 %v3204_v2  ;;  %2860 = vmatprep.subr.bf16.mxu1 %v3204_v2  ;;  %v3026_v19 = vld [vmem:[#allocation3 + $0xa8] sm:$0xff]   ;;  %v3028_v21 = vld [vmem:[#allocation3 + $0xb0] sm:$0xff]   ;;  %v3029_v22 = vld [vmem:[#allocation3 + $0x38] sm:$0xff]  }
  0x2e   :  { %v3030_v23 = vld [vmem:[#allocation3 + $0xb8] sm:$0xff]   ;;  %v3031_v24 = vld [vmem:[#allocation3 + $0x40] sm:$0xff]   ;;  %v3033_v26 = vld [vmem:[#allocation3 + $0x48] sm:$0xff]  }
  0x2f   :  { %v3032_v25 = vld [vmem:[#allocation3 + $0xc0] sm:$0xff]   ;;  %v3034_v27 = vld [vmem:[#allocation3 + $0xc8] sm:$0xff]   ;;  %v3035_v28 = vld [vmem:[#allocation3 + $0x50] sm:$0xff]  }
  0x30   :  { %2813 = vmatpush3.bf16.msra.mxu0 %v3204_v2  ;;  %2861 = vmatpush3.bf16.msra.mxu1 %v3204_v2  ;;  %v3036_v29 = vld [vmem:[#allocation3 + $0xd0] sm:$0xff]   ;;  %v3037_v30 = vld [vmem:[#allocation3 + $0x58] sm:$0xff]   ;;  %v3039_v32 = vld [vmem:[#allocation3 + $0x60] sm:$0xff]  }
  0x31   :  { %2814 = vmatprep.subr.bf16.mxu0 %v3206_v3  ;;  %2862 = vmatprep.subr.bf16.mxu1 %v3206_v3  ;;  %v3038_v31 = vld [vmem:[#allocation3 + $0xd8] sm:$0xff]   ;;  %v3040_v33 = vld [vmem:[#allocation3 + $0xe0] sm:$0xff]   ;;  %v3041_v34 = vld [vmem:[#allocation3 + $0x68] sm:$0xff]  }
  0x32   :  { %v3042_v35 = vld [vmem:[#allocation3 + $0xe8] sm:$0xff]   ;;  %v3043_v36 = vld [vmem:[#allocation3 + $0x70] sm:$0xff]   ;;  %v3045_v38 = vld [vmem:[#allocation3 + $0x78] sm:$0xff]  }
  0x33   :  { %v3044_v37 = vld [vmem:[#allocation3 + $0xf0] sm:$0xff]   ;;  %v3046_v39 = vld [vmem:[#allocation3 + $0xf8] sm:$0xff]   ;;  %v3047_v40 = vld [vmem:[#allocation3 + $0x100] sm:$0xff]  }
  0x34   :  { %2815 = vmatpush3.bf16.msra.mxu0 %v3206_v3  ;;  %2863 = vmatpush3.bf16.msra.mxu1 %v3206_v3  ;;  %v3048_v41 = vld [vmem:[#allocation3 + $0x180] sm:$0xff]   ;;  %v3049_v42 = vld [vmem:[#allocation3 + $0x108] sm:$0xff]   ;;  %v3051_v44 = vld [vmem:[#allocation3 + $0x110] sm:$0xff]  }
  0x35   :  { %2816 = vmatprep.subr.bf16.mxu0 %v3214_v6  ;;  %2864 = vmatprep.subr.bf16.mxu1 %v3214_v6  ;;  %v3050_v43 = vld [vmem:[#allocation3 + $0x188] sm:$0xff]   ;;  %v3052_v45 = vld [vmem:[#allocation3 + $0x190] sm:$0xff]   ;;  %v3053_v46 = vld [vmem:[#allocation3 + $0x118] sm:$0xff]  }
  0x36   :  { %v3054_v47 = vld [vmem:[#allocation3 + $0x198] sm:$0xff]   ;;  %v3055_v48 = vld [vmem:[#allocation3 + $0x120] sm:$0xff]   ;;  %v3057_v50 = vld [vmem:[#allocation3 + $0x128] sm:$0xff]  }
  0x37   :  { %v3056_v49 = vld [vmem:[#allocation3 + $0x1a0] sm:$0xff]   ;;  %v3058_v51 = vld [vmem:[#allocation3 + $0x1a8] sm:$0xff]   ;;  %v3059_v52 = vld [vmem:[#allocation3 + $0x130] sm:$0xff]  }
  0x38   :  { %2817 = vmatpush3.bf16.msra.mxu0 %v3214_v6  ;;  %2865 = vmatpush3.bf16.msra.mxu1 %v3214_v6  ;;  %v3060_v53 = vld [vmem:[#allocation3 + $0x1b0] sm:$0xff]   ;;  %v3061_v54 = vld [vmem:[#allocation3 + $0x138] sm:$0xff]   ;;  %v3063_v56 = vld [vmem:[#allocation3 + $0x140] sm:$0xff]  }
  0x39   :  { %2818 = vmatprep.subr.bf16.mxu0 %v3220_v7  ;;  %2866 = vmatprep.subr.bf16.mxu1 %v3220_v7  ;;  %v3062_v55 = vld [vmem:[#allocation3 + $0x1b8] sm:$0xff]   ;;  %v3064_v57 = vld [vmem:[#allocation3 + $0x1c0] sm:$0xff]   ;;  %v3065_v58 = vld [vmem:[#allocation3 + $0x148] sm:$0xff]  }
  0x3a   :  { %v3066_v59 = vld [vmem:[#allocation3 + $0x1c8] sm:$0xff]   ;;  %v3067_v60 = vld [vmem:[#allocation3 + $0x150] sm:$0xff]   ;;  %v3069_v62 = vld [vmem:[#allocation3 + $0x158] sm:$0xff]  }
  0x3b   :  { %v3068_v61 = vld [vmem:[#allocation3 + $0x1d0] sm:$0xff]   ;;  %v3070_v63 = vld [vmem:[#allocation3 + $0x1d8] sm:$0xff]  }
  0x3c   :  { %2819 = vmatpush3.bf16.msra.mxu0 %v3220_v7  ;;  %2867 = vmatpush3.bf16.msra.mxu1 %v3220_v7  ;;  %v3075_v4 = vld [vmem:[#allocation3 + $0x170] sm:$0xff]  }
  0x3d   :  { %2820 = vmatprep.subr.bf16.mxu0 %v3226_v8  ;;  %2868 = vmatprep.subr.bf16.mxu1 %v3226_v8  ;;  %v3076_v5 = vld [vmem:[#allocation3 + $0x1f0] sm:$0xff]  }
  0x40   :  { %2821 = vmatpush3.bf16.msra.mxu0 %v3226_v8  ;;  %2869 = vmatpush3.bf16.msra.mxu1 %v3226_v8 }
  0x41   :  { %2822 = vmatprep.subr.bf16.mxu0 %v3232_v9  ;;  %2870 = vmatprep.subr.bf16.mxu1 %v3232_v9 }
  0x44   :  { %2823 = vmatpush3.bf16.msra.mxu0 %v3232_v9  ;;  %2871 = vmatpush3.bf16.msra.mxu1 %v3232_v9 }
  0x45   :  { %2904 = vmatprep.subr.bf16.mxu0 %v3007_v0  ;;  %2952 = vmatprep.subr.bf16.mxu1 %v3007_v0 }
  0x47   :  { %2825 = vmatmul.mubr.bf16.vlgmr.msra.gmra.mrb[0].mxu0 %v3017_v10  ;;  %2873 = vmatmul.mubr.bf16.vlgmr.msra.gmra.mrb[0].mxu1 %v3018_v11 }
  0x48   :  { %2905 = vmatpush3.bf16.msra.mxu0 %v3007_v0  ;;  %2953 = vmatpush3.bf16.msra.mxu1 %v3007_v0  ;;  %v3071_v0 = vld [vmem:[#allocation3 + $0x160] sm:$0xff]  }
  0x49   :  { %2828 = vmatprep.mubr.bf16.mxu0 %v3019_v12  ;;  %2876 = vmatprep.mubr.bf16.mxu1 %v3020_v13 }
  0x4a   :  { %2906 = vmatprep.subr.bf16.mxu0 %v3008_v1  ;;  %2954 = vmatprep.subr.bf16.mxu1 %v3008_v1 }
  0x4c   :  { %2907 = vmatpush3.bf16.msra.mxu0 %v3008_v1  ;;  %2955 = vmatpush3.bf16.msra.mxu1 %v3008_v1  ;;  %v3072_v1 = vld [vmem:[#allocation3 + $0x1e0] sm:$0xff]  }
  0x4d   :  { %2908 = vmatprep.subr.bf16.mxu0 %v3204_v2  ;;  %2956 = vmatprep.subr.bf16.mxu1 %v3204_v2 }
  0x4f   :  { %2829 = vmatmul.mubr.bf16.gmra.mrb[4].mxu0 %v3021_v14  ;;  %2877 = vmatmul.mubr.bf16.gmra.mrb[4].mxu1 %v3022_v15 }
  0x50   :  { %2832 = vmatprep.mubr.bf16.mxu0 %v3023_v16  ;;  %2880 = vmatprep.mubr.bf16.mxu1 %v3024_v17 }
  0x51   :  { %2909 = vmatpush3.bf16.msra.mxu0 %v3204_v2  ;;  %2957 = vmatpush3.bf16.msra.mxu1 %v3204_v2  ;;  %v3073_v2 = vld [vmem:[#allocation3 + $0x168] sm:$0xff]  }
  0x52   :  { %2910 = vmatprep.subr.bf16.mxu0 %v3206_v3  ;;  %2958 = vmatprep.subr.bf16.mxu1 %v3206_v3 }
  0x55   :  { %2911 = vmatpush3.bf16.msra.mxu0 %v3206_v3  ;;  %2959 = vmatpush3.bf16.msra.mxu1 %v3206_v3  ;;  %v3074_v3 = vld [vmem:[#allocation3 + $0x1e8] sm:$0xff]  }
  0x56   :  { %2912 = vmatprep.subr.bf16.mxu0 %v3214_v6  ;;  %2960 = vmatprep.subr.bf16.mxu1 %v3214_v6 }
  0x57   :  { %2833 = vmatmul.mubr.bf16.gmra.mrb[8].mxu0 %v3025_v18  ;;  %2881 = vmatmul.mubr.bf16.gmra.mrb[8].mxu1 %v3026_v19 }
  0x58   :  { %2836 = vmatprep.mubr.bf16.mxu0 %v3027_v20  ;;  %2884 = vmatprep.mubr.bf16.mxu1 %v3028_v21 }
  0x59   :  { %2913 = vmatpush3.bf16.msra.mxu0 %v3214_v6  ;;  %2961 = vmatpush3.bf16.msra.mxu1 %v3214_v6  ;;  %v3077_v6 = vld [vmem:[#allocation3 + $0x178] sm:$0xff]  }
  0x5a   :  { %2914 = vmatprep.subr.bf16.mxu0 %v3220_v7  ;;  %2962 = vmatprep.subr.bf16.mxu1 %v3220_v7 }
  0x5d   :  { %2915 = vmatpush3.bf16.msra.mxu0 %v3220_v7  ;;  %2963 = vmatpush3.bf16.msra.mxu1 %v3220_v7  ;;  %v3078_v7 = vld [vmem:[#allocation3 + $0x1f8] sm:$0xff]  }
  0x5e   :  { %2916 = vmatprep.subr.bf16.mxu0 %v3226_v8  ;;  %2964 = vmatprep.subr.bf16.mxu1 %v3226_v8 }
  0x5f   :  { %2837 = vmatmul.mubr.bf16.gmra.mrb[12].mxu0 %v3029_v22  ;;  %2885 = vmatmul.mubr.bf16.gmra.mrb[12].mxu1 %v3030_v23 }
  0x60   :  { %2840 = vmatprep.mubr.bf16.mxu0 %v3031_v24  ;;  %2888 = vmatprep.mubr.bf16.mxu1 %v3032_v25 }
  0x61   :  { %2917 = vmatpush3.bf16.msra.mxu0 %v3226_v8  ;;  %2965 = vmatpush3.bf16.msra.mxu1 %v3226_v8 }
  0x62   :  { %2918 = vmatprep.subr.bf16.mxu0 %v3232_v9  ;;  %2966 = vmatprep.subr.bf16.mxu1 %v3232_v9 }
  0x65   :  { %2919 = vmatpush3.bf16.msra.mxu0 %v3232_v9  ;;  %2967 = vmatpush3.bf16.msra.mxu1 %v3232_v9 }
  0x67   :  { %2841 = vmatmul.mubr.bf16.gmra.mrb[16].mxu0 %v3033_v26  ;;  %2889 = vmatmul.mubr.bf16.gmra.mrb[16].mxu1 %v3034_v27 }
  0x68   :  { %2844 = vmatprep.mubr.bf16.mxu0 %v3035_v28  ;;  %2892 = vmatprep.mubr.bf16.mxu1 %v3036_v29 }
  0x6f   :  { %2845 = vmatmul.mubr.bf16.gmra.mrb[20].mxu0 %v3037_v30  ;;  %2893 = vmatmul.mubr.bf16.gmra.mrb[20].mxu1 %v3038_v31 }
  0x70   :  { %2848 = vmatprep.mubr.bf16.mxu0 %v3039_v32  ;;  %2896 = vmatprep.mubr.bf16.mxu1 %v3040_v33 }
  0x77   :  { %2849 = vmatmul.mubr.bf16.gmra.mrb[24].mxu0 %v3041_v34  ;;  %2897 = vmatmul.mubr.bf16.gmra.mrb[24].mxu1 %v3042_v35 }
  0x78   :  { %2852 = vmatprep.mubr.bf16.mxu0 %v3043_v36  ;;  %2900 = vmatprep.mubr.bf16.mxu1 %v3044_v37 }
  0x7f   :  { %2853 = vmatmul.mubr.bf16.gmra.mrb[28].mxu0 %v3045_v38  ;;  %2901 = vmatmul.mubr.bf16.gmra.mrb[28].mxu1 %v3046_v39 }
  0x80   :  { %2920 = vmatprep.mubr.bf16.mxu0 %v3047_v40  ;;  %2968 = vmatprep.mubr.bf16.mxu1 %v3048_v41 }
  0x87   :  { %2921 = vmatmul.mubr.bf16.vlgmr.msra.gmra.mrb[32].mxu0 %v3049_v42  ;;  %2969 = vmatmul.mubr.bf16.vlgmr.msra.gmra.mrb[32].mxu1 %v3050_v43 }
  0x88   :  { %2924 = vmatprep.mubr.bf16.mxu0 %v3051_v44  ;;  %2972 = vmatprep.mubr.bf16.mxu1 %v3052_v45 }
  0x8f   :  { %2925 = vmatmul.mubr.bf16.gmra.mrb[36].mxu0 %v3053_v46  ;;  %2973 = vmatmul.mubr.bf16.gmra.mrb[36].mxu1 %v3054_v47 }
  0x90   :  { %2928 = vmatprep.mubr.bf16.mxu0 %v3055_v48  ;;  %2976 = vmatprep.mubr.bf16.mxu1 %v3056_v49 }
  0x97   :  { %2929 = vmatmul.mubr.bf16.gmra.mrb[40].mxu0 %v3057_v50  ;;  %2977 = vmatmul.mubr.bf16.gmra.mrb[40].mxu1 %v3058_v51 }
  0x98   :  { %2932 = vmatprep.mubr.bf16.mxu0 %v3059_v52  ;;  %2980 = vmatprep.mubr.bf16.mxu1 %v3060_v53 }
  0x9f   :  { %2933 = vmatmul.mubr.bf16.gmra.mrb[44].mxu0 %v3061_v54  ;;  %2981 = vmatmul.mubr.bf16.gmra.mrb[44].mxu1 %v3062_v55 }
  0xa0   :  { %2936 = vmatprep.mubr.bf16.mxu0 %v3063_v56  ;;  %2984 = vmatprep.mubr.bf16.mxu1 %v3064_v57 }
  0xa7   :  { %2937 = vmatmul.mubr.bf16.gmra.mrb[48].mxu0 %v3065_v58  ;;  %2985 = vmatmul.mubr.bf16.gmra.mrb[48].mxu1 %v3066_v59 }
  0xa8   :  { %2940 = vmatprep.mubr.bf16.mxu0 %v3067_v60  ;;  %2988 = vmatprep.mubr.bf16.mxu1 %v3068_v61 }
  0xaf   :  { %2941 = vmatmul.mubr.bf16.gmra.mrb[52].mxu0 %v3069_v62  ;;  %2989 = vmatmul.mubr.bf16.gmra.mrb[52].mxu1 %v3070_v63 }
  0xb0   :  { %2944 = vmatprep.mubr.bf16.mxu0 %v3071_v0  ;;  %2992 = vmatprep.mubr.bf16.mxu1 %v3072_v1 }
  0xb7   :  { %2945 = vmatmul.mubr.bf16.gmra.mrb[56].mxu0 %v3073_v2  ;;  %2993 = vmatmul.mubr.bf16.gmra.mrb[56].mxu1 %v3074_v3 }
  0xb8   :  { %2948 = vmatprep.mubr.bf16.mxu0 %v3075_v4  ;;  %2996 = vmatprep.mubr.bf16.mxu1 %v3076_v5 }
  0xbf   :  { %2949 = vmatmul.mubr.bf16.gmra.mrb[60].mxu0 %v3077_v6  ;;  %2997 = vmatmul.mubr.bf16.gmra.mrb[60].mxu1 %v3078_v7 }
 0x11a   :  { %v3264_v8 = vpop.f32.mrb[0].mxu0  ;;  %v3266_v9 = vpop.f32.mrb[0].mxu1 }
 0x11b   :  { %5254 = vst [vmem:[#allocation12_spill] sm:$0xff] %v3266_v9  ;;  %v3268_v10 = vpop.f32.mrb[1].mxu0  ;;  %v3270_v11 = vpop.f32.mrb[1].mxu1  ;;  %v469_v22 = vmul.f32 %v3264_v8, %v3264_v8  ;;  %v900_v23 = vmul.f32 %v3266_v9, %v3266_v9 }
 0x11c   :  { %5255 = vst [vmem:[#allocation13_spill] sm:$0xff] %v3270_v11  ;;  %v898_v12 = vmul.f32 %v3270_v11, %v3270_v11  ;;  %v3274_v13 = vpop.f32.mrb[2].mxu0  ;;  %v3276_v14 = vpop.f32.mrb[2].mxu1  ;;  %v467_v15 = vmul.f32 %v3268_v10, %v3268_v10 }
 0x11d   :  { %5256 = vst [vmem:[#allocation14_spill] sm:$0xff] %v3276_v14  ;;  %v3280_v16 = vpop.f32.mrb[3].mxu0  ;;  %v3282_v17 = vpop.f32.mrb[3].mxu1  ;;  %v470_v28 = vmul.f32 %v3274_v13, %v3274_v13  ;;  %v901_v35 = vmul.f32 %v3276_v14, %v3276_v14 }
 0x11e   :  { %5257 = vst [vmem:[#allocation15_spill] sm:$0xff] %v3282_v17  ;;  %v429_v18 = vadd.f32 %v3280_v16, %v3268_v10  ;;  %v468_v19 = vmul.f32 %v3280_v16, %v3280_v16  ;;  %v860_v20 = vadd.f32 %v3282_v17, %v3270_v11  ;;  %v899_v21 = vmul.f32 %v3282_v17, %v3282_v17 }
 0x120   :  { %v430_v24 = vadd.f32 %v3264_v8, %v429_v18  ;;  %v499_v25 = vadd.f32 %v468_v19, %v467_v15  ;;  %v861_v26 = vadd.f32 %v3266_v9, %v860_v20  ;;  %v930_v27 = vadd.f32 %v899_v21, %v898_v12 }
 0x122   :  { %v500_v29 = vadd.f32 %v499_v25, %v469_v22  ;;  %v931_v30 = vadd.f32 %v930_v27, %v900_v23  ;;  %v3300_v31 = vpop.f32.mrb[4].mxu0  ;;  %v3302_v32 = vpop.f32.mrb[4].mxu1  ;;  %v431_v33 = vadd.f32 %v3274_v13, %v430_v24  ;;  %v862_v34 = vadd.f32 %v3276_v14, %v861_v26 }
 0x123   :  { %5258 = vst [vmem:[#allocation16_spill] sm:$0xff] %v3302_v32  ;;  %v3308_v36 = vpop.f32.mrb[5].mxu0  ;;  %v3310_v37 = vpop.f32.mrb[5].mxu1  ;;  %v473_v54 = vmul.f32 %v3300_v31, %v3300_v31  ;;  %v904_v58 = vmul.f32 %v3302_v32, %v3302_v32 }
 0x124   :  { %5259 = vst [vmem:[#allocation17_spill] sm:$0xff] %v3310_v37  ;;  %v432_v38 = vadd.f32 %v431_v33, %v3308_v36  ;;  %v471_v39 = vmul.f32 %v3308_v36, %v3308_v36  ;;  %v501_v40 = vadd.f32 %v500_v29, %v470_v28  ;;  %v863_v41 = vadd.f32 %v862_v34, %v3310_v37  ;;  %v3316_v42 = vpop.f32.mrb[6].mxu0  ;;  %v3318_v43 = vpop.f32.mrb[6].mxu1 }
 0x125   :  { %5260 = vst [vmem:[#allocation18_spill] sm:$0xff] %v3318_v43  ;;  %v902_v44 = vmul.f32 %v3310_v37, %v3310_v37  ;;  %v932_v45 = vadd.f32 %v931_v30, %v901_v35  ;;  %v3322_v46 = vpop.f32.mrb[7].mxu0  ;;  %v3324_v47 = vpop.f32.mrb[7].mxu1  ;;  %v474_v60 = vmul.f32 %v3316_v42, %v3316_v42  ;;  %v905_v2 = vmul.f32 %v3318_v43, %v3318_v43 }
 0x126   :  { %5261 = vst [vmem:[#allocation19_spill] sm:$0xff] %v3324_v47  ;;  %v502_v48 = vadd.f32 %v501_v40, %v471_v39  ;;  %v433_v49 = vadd.f32 %v432_v38, %v3322_v46  ;;  %v472_v50 = vmul.f32 %v3322_v46, %v3322_v46  ;;  %v864_v51 = vadd.f32 %v863_v41, %v3324_v47 }
 0x127   :  { %v933_v52 = vadd.f32 %v932_v45, %v902_v44  ;;  %v903_v53 = vmul.f32 %v3324_v47, %v3324_v47 }
 0x128   :  { %v434_v55 = vadd.f32 %v3300_v31, %v433_v49  ;;  %v503_v56 = vadd.f32 %v502_v48, %v472_v50  ;;  %v865_v57 = vadd.f32 %v3302_v32, %v864_v51 }
 0x129   :  { %v934_v59 = vadd.f32 %v933_v52, %v903_v53 }
 0x12a   :  { %v504_v61 = vadd.f32 %v503_v56, %v473_v54  ;;  %v3340_v62 = vpop.f32.mrb[8].mxu0  ;;  %v3342_v63 = vpop.f32.mrb[8].mxu1  ;;  %v435_v0 = vadd.f32 %v3316_v42, %v434_v55  ;;  %v866_v1 = vadd.f32 %v3318_v43, %v865_v57 }
 0x12b   :  { %5262 = vst [vmem:[#allocation20_spill] sm:$0xff] %v3342_v63  ;;  %v935_v3 = vadd.f32 %v934_v59, %v904_v58  ;;  %v3348_v4 = vpop.f32.mrb[9].mxu0  ;;  %v3350_v5 = vpop.f32.mrb[9].mxu1  ;;  %v477_v30 = vmul.f32 %v3340_v62, %v3340_v62  ;;  %v908_v38 = vmul.f32 %v3342_v63, %v3342_v63 }
 0x12c   :  { %5263 = vst [vmem:[#allocation21_spill] sm:$0xff] %v3350_v5  ;;  %v436_v6 = vadd.f32 %v435_v0, %v3348_v4  ;;  %v475_v7 = vmul.f32 %v3348_v4, %v3348_v4  ;;  %v505_v12 = vadd.f32 %v504_v61, %v474_v60  ;;  %v867_v15 = vadd.f32 %v866_v1, %v3350_v5  ;;  %v3356_v18 = vpop.f32.mrb[10].mxu0  ;;  %v3358_v19 = vpop.f32.mrb[10].mxu1 }
 0x12d   :  { %5264 = vst [vmem:[#allocation22_spill] sm:$0xff] %v3358_v19  ;;  %v906_v20 = vmul.f32 %v3350_v5, %v3350_v5  ;;  %v936_v21 = vadd.f32 %v935_v3, %v905_v2  ;;  %v3362_v22 = vpop.f32.mrb[11].mxu0  ;;  %v3364_v23 = vpop.f32.mrb[11].mxu1  ;;  %v478_v40 = vmul.f32 %v3356_v18, %v3356_v18  ;;  %v909_v50 = vmul.f32 %v3358_v19, %v3358_v19 }
 0x12e   :  { %5265 = vst [vmem:[#allocation23_spill] sm:$0xff] %v3364_v23  ;;  %v506_v24 = vadd.f32 %v505_v12, %v475_v7  ;;  %v437_v25 = vadd.f32 %v436_v6, %v3362_v22  ;;  %v476_v26 = vmul.f32 %v3362_v22, %v3362_v22  ;;  %v868_v27 = vadd.f32 %v867_v15, %v3364_v23 }
 0x12f   :  { %v937_v28 = vadd.f32 %v936_v21, %v906_v20  ;;  %v907_v29 = vmul.f32 %v3364_v23, %v3364_v23 }
 0x130   :  { %v438_v33 = vadd.f32 %v3340_v62, %v437_v25  ;;  %v507_v34 = vadd.f32 %v506_v24, %v476_v26  ;;  %v869_v35 = vadd.f32 %v3342_v63, %v868_v27 }
 0x131   :  { %v938_v39 = vadd.f32 %v937_v28, %v907_v29 }
 0x132   :  { %v508_v41 = vadd.f32 %v507_v34, %v477_v30  ;;  %v3380_v44 = vpop.f32.mrb[12].mxu0  ;;  %v3382_v45 = vpop.f32.mrb[12].mxu1  ;;  %v439_v48 = vadd.f32 %v3356_v18, %v438_v33  ;;  %v870_v49 = vadd.f32 %v3358_v19, %v869_v35 }
 0x133   :  { %5266 = vst [vmem:[#allocation24_spill] sm:$0xff] %v3382_v45  ;;  %v939_v51 = vadd.f32 %v938_v39, %v908_v38  ;;  %v3388_v52 = vpop.f32.mrb[13].mxu0  ;;  %v3390_v53 = vpop.f32.mrb[13].mxu1  ;;  %v481_v20 = vmul.f32 %v3380_v44, %v3380_v44  ;;  %v912_v26 = vmul.f32 %v3382_v45, %v3382_v45 }
 0x134   :  { %5267 = vst [vmem:[#allocation25_spill] sm:$0xff] %v3390_v53  ;;  %v440_v54 = vadd.f32 %v439_v48, %v3388_v52  ;;  %v479_v55 = vmul.f32 %v3388_v52, %v3388_v52  ;;  %v509_v56 = vadd.f32 %v508_v41, %v478_v40  ;;  %v871_v57 = vadd.f32 %v870_v49, %v3390_v53  ;;  %v3396_v58 = vpop.f32.mrb[14].mxu0  ;;  %v3398_v59 = vpop.f32.mrb[14].mxu1 }
 0x135   :  { %5268 = vst [vmem:[#allocation26_spill] sm:$0xff] %v3398_v59  ;;  %v910_v60 = vmul.f32 %v3390_v53, %v3390_v53  ;;  %v940_v61 = vadd.f32 %v939_v51, %v909_v50  ;;  %v3402_v0 = vpop.f32.mrb[15].mxu0  ;;  %v3404_v1 = vpop.f32.mrb[15].mxu1  ;;  %v482_v28 = vmul.f32 %v3396_v58, %v3396_v58  ;;  %v913_v38 = vmul.f32 %v3398_v59, %v3398_v59 }
 0x136   :  { %5269 = vst [vmem:[#allocation27_spill] sm:$0xff] %v3404_v1  ;;  %v510_v2 = vadd.f32 %v509_v56, %v479_v55  ;;  %v441_v3 = vadd.f32 %v440_v54, %v3402_v0  ;;  %v480_v6 = vmul.f32 %v3402_v0, %v3402_v0  ;;  %v872_v7 = vadd.f32 %v871_v57, %v3404_v1 }
 0x137   :  { %v941_v12 = vadd.f32 %v940_v61, %v910_v60  ;;  %v911_v15 = vmul.f32 %v3404_v1, %v3404_v1 }
 0x138   :  { %v442_v21 = vadd.f32 %v3380_v44, %v441_v3  ;;  %v511_v24 = vadd.f32 %v510_v2, %v480_v6  ;;  %v873_v25 = vadd.f32 %v3382_v45, %v872_v7 }
 0x139   :  { %v942_v27 = vadd.f32 %v941_v12, %v911_v15 }
 0x13a   :  { %v512_v29 = vadd.f32 %v511_v24, %v481_v20  ;;  %v3420_v30 = vpop.f32.mrb[16].mxu0  ;;  %v3422_v33 = vpop.f32.mrb[16].mxu1  ;;  %v443_v34 = vadd.f32 %v3396_v58, %v442_v21  ;;  %v874_v35 = vadd.f32 %v3398_v59, %v873_v25 }
 0x13b   :  { %5270 = vst [vmem:[#allocation28_spill] sm:$0xff] %v3422_v33  ;;  %v943_v39 = vadd.f32 %v942_v27, %v912_v26  ;;  %v3428_v40 = vpop.f32.mrb[17].mxu0  ;;  %v3430_v41 = vpop.f32.mrb[17].mxu1  ;;  %v485_v20 = vmul.f32 %v3420_v30, %v3420_v30  ;;  %v916_v26 = vmul.f32 %v3422_v33, %v3422_v33 }
 0x13c   :  { %5271 = vst [vmem:[#allocation29_spill] sm:$0xff] %v3430_v41  ;;  %v444_v48 = vadd.f32 %v443_v34, %v3428_v40  ;;  %v483_v49 = vmul.f32 %v3428_v40, %v3428_v40  ;;  %v513_v50 = vadd.f32 %v512_v29, %v482_v28  ;;  %v875_v51 = vadd.f32 %v874_v35, %v3430_v41  ;;  %v3436_v54 = vpop.f32.mrb[18].mxu0  ;;  %v3438_v55 = vpop.f32.mrb[18].mxu1 }
 0x13d   :  { %5272 = vst [vmem:[#allocation30_spill] sm:$0xff] %v3438_v55  ;;  %v914_v56 = vmul.f32 %v3430_v41, %v3430_v41  ;;  %v944_v57 = vadd.f32 %v943_v39, %v913_v38  ;;  %v3442_v60 = vpop.f32.mrb[19].mxu0  ;;  %v3444_v61 = vpop.f32.mrb[19].mxu1  ;;  %v486_v28 = vmul.f32 %v3436_v54, %v3436_v54 }
 0x13e   :  { %5273 = vst [vmem:[#allocation31_spill] sm:$0xff] %v3444_v61  ;;  %v514_v2 = vadd.f32 %v513_v50, %v483_v49  ;;  %v445_v3 = vadd.f32 %v444_v48, %v3442_v60  ;;  %v484_v6 = vmul.f32 %v3442_v60, %v3442_v60  ;;  %v876_v7 = vadd.f32 %v875_v51, %v3444_v61 }
 0x13f   :  { %v945_v12 = vadd.f32 %v944_v57, %v914_v56  ;;  %v915_v15 = vmul.f32 %v3444_v61, %v3444_v61  ;;  %v917_v48 = vmul.f32 %v3438_v55, %v3438_v55 }
 0x140   :  { %v446_v21 = vadd.f32 %v3420_v30, %v445_v3  ;;  %v515_v24 = vadd.f32 %v514_v2, %v484_v6  ;;  %v877_v25 = vadd.f32 %v3422_v33, %v876_v7 }
 0x141   :  { %v946_v27 = vadd.f32 %v945_v12, %v915_v15 }
 0x142   :  { %v516_v29 = vadd.f32 %v515_v24, %v485_v20  ;;  %v3460_v34 = vpop.f32.mrb[20].mxu0  ;;  %v3462_v35 = vpop.f32.mrb[20].mxu1  ;;  %v447_v38 = vadd.f32 %v3436_v54, %v446_v21  ;;  %v878_v39 = vadd.f32 %v3438_v55, %v877_v25 }
 0x143   :  { %5274 = vst [vmem:[#allocation32_spill] sm:$0xff] %v3462_v35  ;;  %v947_v49 = vadd.f32 %v946_v27, %v916_v26  ;;  %v3468_v50 = vpop.f32.mrb[21].mxu0  ;;  %v3470_v51 = vpop.f32.mrb[21].mxu1 }
 0x144   :  { %5275 = vst [vmem:[#allocation33_spill] sm:$0xff] %v3470_v51  ;;  %v448_v56 = vadd.f32 %v447_v38, %v3468_v50  ;;  %v487_v57 = vmul.f32 %v3468_v50, %v3468_v50  ;;  %v517_v2 = vadd.f32 %v516_v29, %v486_v28  ;;  %v879_v3 = vadd.f32 %v878_v39, %v3470_v51  ;;  %v3476_v6 = vpop.f32.mrb[22].mxu0  ;;  %v3478_v7 = vpop.f32.mrb[22].mxu1 }
 0x145   :  { %5276 = vst [vmem:[#allocation34_spill] sm:$0xff] %v3478_v7  ;;  %v918_v12 = vmul.f32 %v3470_v51, %v3470_v51  ;;  %v948_v15 = vadd.f32 %v947_v49, %v917_v48  ;;  %v3482_v20 = vpop.f32.mrb[23].mxu0  ;;  %v3484_v21 = vpop.f32.mrb[23].mxu1  ;;  %v489_v38 = vmul.f32 %v3460_v34, %v3460_v34 }
 0x146   :  { %5277 = vst [vmem:[#allocation35_spill] sm:$0xff] %v3484_v21  ;;  %v518_v24 = vadd.f32 %v517_v2, %v487_v57  ;;  %v449_v25 = vadd.f32 %v448_v56, %v3482_v20  ;;  %v488_v26 = vmul.f32 %v3482_v20, %v3482_v20  ;;  %v880_v27 = vadd.f32 %v879_v3, %v3484_v21 }
 0x147   :  { %v949_v28 = vadd.f32 %v948_v15, %v918_v12  ;;  %v919_v29 = vmul.f32 %v3484_v21, %v3484_v21  ;;  %v920_v56 = vmul.f32 %v3462_v35, %v3462_v35  ;;  %v490_v2 = vmul.f32 %v3476_v6, %v3476_v6 }
 0x148   :  { %v450_v39 = vadd.f32 %v3460_v34, %v449_v25  ;;  %v519_v48 = vadd.f32 %v518_v24, %v488_v26  ;;  %v881_v49 = vadd.f32 %v3462_v35, %v880_v27  ;;  %v921_v24 = vmul.f32 %v3478_v7, %v3478_v7 }
 0x149   :  { %v950_v57 = vadd.f32 %v949_v28, %v919_v29 }
 0x14a   :  { %v520_v3 = vadd.f32 %v519_v48, %v489_v38  ;;  %v3500_v12 = vpop.f32.mrb[24].mxu0  ;;  %v3502_v15 = vpop.f32.mrb[24].mxu1  ;;  %v451_v21 = vadd.f32 %v3476_v6, %v450_v39  ;;  %v882_v51 = vadd.f32 %v3478_v7, %v881_v49 }
 0x14b   :  { %5278 = vst [vmem:[#allocation36_spill] sm:$0xff] %v3502_v15  ;;  %v951_v25 = vadd.f32 %v950_v57, %v920_v56  ;;  %v3508_v26 = vpop.f32.mrb[25].mxu0  ;;  %v3510_v27 = vpop.f32.mrb[25].mxu1 }
 0x14c   :  { %5279 = vst [vmem:[#allocation37_spill] sm:$0xff] %v3510_v27  ;;  %v452_v28 = vadd.f32 %v451_v21, %v3508_v26  ;;  %v491_v29 = vmul.f32 %v3508_v26, %v3508_v26  ;;  %v521_v38 = vadd.f32 %v520_v3, %v490_v2  ;;  %v883_v48 = vadd.f32 %v882_v51, %v3510_v27  ;;  %v3516_v35 = vpop.f32.mrb[26].mxu0  ;;  %v3518_v39 = vpop.f32.mrb[26].mxu1 }
 0x14d   :  { %5280 = vst [vmem:[#allocation38_spill] sm:$0xff] %v3518_v39  ;;  %v922_v49 = vmul.f32 %v3510_v27, %v3510_v27  ;;  %v952_v56 = vadd.f32 %v951_v25, %v921_v24  ;;  %v3522_v57 = vpop.f32.mrb[27].mxu0  ;;  %v3524_v7 = vpop.f32.mrb[27].mxu1  ;;  %v493_v27 = vmul.f32 %v3500_v12, %v3500_v12 }
 0x14e   :  { %5281 = vst [vmem:[#allocation39_spill] sm:$0xff] %v3524_v7  ;;  %v522_v55 = vadd.f32 %v521_v38, %v491_v29  ;;  %v453_v21 = vadd.f32 %v452_v28, %v3522_v57  ;;  %v492_v2 = vmul.f32 %v3522_v57, %v3522_v57  ;;  %v884_v51 = vadd.f32 %v883_v48, %v3524_v7 }
 0x14f   :  { %v953_v3 = vadd.f32 %v952_v56, %v922_v49  ;;  %v923_v33 = vmul.f32 %v3524_v7, %v3524_v7  ;;  %v924_v28 = vmul.f32 %v3502_v15, %v3502_v15  ;;  %v494_v38 = vmul.f32 %v3516_v35, %v3516_v35 }
 0x150   :  { %v454_v24 = vadd.f32 %v3500_v12, %v453_v21  ;;  %v523_v25 = vadd.f32 %v522_v55, %v492_v2  ;;  %v885_v61 = vadd.f32 %v3502_v15, %v884_v51  ;;  %v925_v55 = vmul.f32 %v3518_v39, %v3518_v39 }
 0x151   :  { %v954_v29 = vadd.f32 %v953_v3, %v923_v33 }
 0x152   :  { %v524_v48 = vadd.f32 %v523_v25, %v493_v27  ;;  %v3540_v49 = vpop.f32.mrb[28].mxu0  ;;  %v3542_v56 = vpop.f32.mrb[28].mxu1  ;;  %v455_v7 = vadd.f32 %v3516_v35, %v454_v24  ;;  %v886_v41 = vadd.f32 %v3518_v39, %v885_v61 }
 0x153   :  { %5282 = vst [vmem:[#allocation40_spill] sm:$0xff] %v3540_v49  ;;  %5283 = vst [vmem:[#allocation41_spill] sm:$0xff] %v3542_v56  ;;  %v955_v21 = vadd.f32 %v954_v29, %v924_v28  ;;  %v3548_v2 = vpop.f32.mrb[29].mxu0  ;;  %v3550_v51 = vpop.f32.mrb[29].mxu1 }
 0x154   :  { %5284 = vst [vmem:[#allocation42_spill] sm:$0xff] %v3550_v51  ;;  %v456_v33 = vadd.f32 %v455_v7, %v3548_v2  ;;  %v495_v27 = vmul.f32 %v3548_v2, %v3548_v2  ;;  %v525_v3 = vadd.f32 %v524_v48, %v494_v38  ;;  %v887_v25 = vadd.f32 %v886_v41, %v3550_v51  ;;  %v3556_v15 = vpop.f32.mrb[30].mxu0  ;;  %v3558_v24 = vpop.f32.mrb[30].mxu1 }
 0x155   :  { %5285 = vst [vmem:[#allocation43_spill] sm:$0xff] %v3556_v15  ;;  %5286 = vst [vmem:[#allocation44_spill] sm:$0xff] %v3558_v24  ;;  %v926_v61 = vmul.f32 %v3550_v51, %v3550_v51  ;;  %v956_v28 = vadd.f32 %v955_v21, %v925_v55  ;;  %v3562_v29 = vpop.f32.mrb[31].mxu0  ;;  %v3564_v39 = vpop.f32.mrb[31].mxu1  ;;  %v497_v51 = vmul.f32 %v3540_v49, %v3540_v49 }
 0x156   :  { %5287 = vst [vmem:[#allocation45_spill] sm:$0xff] %v3564_v39  ;;  %v526_v59 = vadd.f32 %v525_v3, %v495_v27  ;;  %v457_v7 = vadd.f32 %v456_v33, %v3562_v29  ;;  %v496_v38 = vmul.f32 %v3562_v29, %v3562_v29  ;;  %v888_v41 = vadd.f32 %v887_v25, %v3564_v39 }
 0x157   :  { %v957_v48 = vadd.f32 %v956_v28, %v926_v61  ;;  %v927_v45 = vmul.f32 %v3564_v39, %v3564_v39  ;;  %v928_v33 = vmul.f32 %v3542_v56, %v3542_v56  ;;  %v498_v3 = vmul.f32 %v3556_v15, %v3556_v15 }
 0x158   :  { %v458_v55 = vadd.f32 %v3540_v49, %v457_v7  ;;  %v527_v21 = vadd.f32 %v526_v59, %v496_v38  ;;  %v889_v1 = vadd.f32 %v3542_v56, %v888_v41  ;;  %v929_v59 = vmul.f32 %v3558_v24, %v3558_v24 }
 0x159   :  { %v958_v27 = vadd.f32 %v957_v48, %v927_v45 }
 0x15a   :  { %v459_v25 = vadd.f32 %v3556_v15, %v458_v55  ;;  %v528_v61 = vadd.f32 %v527_v21, %v497_v51  ;;  %v890_v28 = vadd.f32 %v3558_v24, %v889_v1  ;;  %v3582_v39 = vpop.f32.mrb[32].mxu0  ;;  %v3584_v53 = vpop.f32.mrb[32].mxu1 }
 0x15b   :  { %5288 = vst [vmem:[#allocation46_spill] sm:$0xff] %v3582_v39  ;;  %5289 = vst [vmem:[#allocation47_spill] sm:$0xff] %v3584_v53  ;;  %v959_v7 = vadd.f32 %v958_v27, %v928_v33  ;;  %v3588_v38 = vpop.f32.mrb[33].mxu0  ;;  %v3590_v41 = vpop.f32.mrb[33].mxu1  ;;  %v1331_v51 = vmul.f32 %v3582_v39, %v3582_v39  ;;  %v1762_v19 = vmul.f32 %v3584_v53, %v3584_v53 }
 0x15c   :  { %5290 = vst [vmem:[#allocation48_spill] sm:$0xff] %v3588_v38  ;;  %5291 = vst [vmem:[#allocation49_spill] sm:$0xff] %v3590_v41  ;;  %v460_v45 = vrot.slane %v459_v25, 4  ;;  %v529_v48 = vadd.f32 %v528_v61, %v498_v3  ;;  %v891_v56 = vrot.slane %v890_v28, 4  ;;  %v3594_v55 = vpop.f32.mrb[34].mxu0  ;;  %v3596_v1 = vpop.f32.mrb[34].mxu1  ;;  %v1329_v33 = vmul.f32 %v3588_v38, %v3588_v38 }
 0x15d   :  { %5292 = vst [vmem:[#allocation50_spill] sm:$0xff] %v3594_v55  ;;  %5293 = vst [vmem:[#allocation51_spill] sm:$0xff] %v3596_v1  ;;  %v960_v21 = vadd.f32 %v959_v7, %v929_v59  ;;  %v1760_v27 = vmul.f32 %v3590_v41, %v3590_v41  ;;  %v3604_v24 = vpop.f32.mrb[35].mxu0  ;;  %v3606_v3 = vpop.f32.mrb[35].mxu1 }
 0x15e   :  { %5294 = vst [vmem:[#allocation52_spill] sm:$0xff] %v3604_v24  ;;  %5295 = vst [vmem:[#allocation53_spill] sm:$0xff] %v3606_v3  ;;  %v461_v61 = vadd.f32 %v460_v45, %v459_v25  ;;  %v530_v63 = vrot.slane %v529_v48, 4  ;;  %v892_v23 = vadd.f32 %v891_v56, %v890_v28  ;;  %v1291_v5 = vadd.f32 %v3604_v24, %v3588_v38 }
 0x15f   :  { %v961_v59 = vrot.slane %v960_v21, 4  ;;  %v1330_v7 = vmul.f32 %v3604_v24, %v3604_v24  ;;  %v1722_v43 = vadd.f32 %v3606_v3, %v3590_v41  ;;  %v1761_v32 = vmul.f32 %v3606_v3, %v3606_v3 }
 0x160   :  { %v462_v47 = vrot.slane %v461_v61, 2  ;;  %v531_v37 = vadd.f32 %v530_v63, %v529_v48  ;;  %v893_v14 = vrot.slane %v892_v23, 2  ;;  %v1292_v25 = vadd.f32 %v3582_v39, %v1291_v5 }
 0x161   :  { %v962_v45 = vadd.f32 %v961_v59, %v960_v21  ;;  %v1361_v56 = vadd.f32 %v1330_v7, %v1329_v33  ;;  %v1723_v28 = vadd.f32 %v3584_v53, %v1722_v43  ;;  %v1792_v38 = vadd.f32 %v1761_v32, %v1760_v27 }
 0x162   :  { %v463_v9 = vadd.f32 %v462_v47, %v461_v61  ;;  %v532_v17 = vrot.slane %v531_v37, 2  ;;  %v894_v11 = vadd.f32 %v893_v14, %v892_v23  ;;  %v3618_v24 = vpop.f32.mrb[36].mxu0  ;;  %v3620_v15 = vpop.f32.mrb[36].mxu1  ;;  %v1293_v41 = vadd.f32 %v3594_v55, %v1292_v25 }
 0x163   :  { %5296 = vst [vmem:[#allocation54_spill] sm:$0xff] %v3620_v15  ;;  %v963_v3 = vrot.slane %v962_v45, 2  ;;  %v1332_v63 = vmul.f32 %v3594_v55, %v3594_v55  ;;  %v1362_v48 = vadd.f32 %v1361_v56, %v1331_v51  ;;  %v1793_v5 = vadd.f32 %v1792_v38, %v1762_v19  ;;  %v3625_v21 = vpop.f32.mrb[37].mxu0  ;;  %v3627_v33 = vpop.f32.mrb[37].mxu1 }
 0x164   :  { %5297 = vst [vmem:[#allocation55_spill] sm:$0xff] %v3625_v21  ;;  %5298 = vst [vmem:[#allocation56_spill] sm:$0xff] %v3627_v33  ;;  %v464_v32 = vrot.slane %v463_v9, 1  ;;  %v533_v43 = vadd.f32 %v532_v17, %v531_v37  ;;  %v895_v47 = vrot.slane %v894_v11, 1  ;;  %v1763_v14 = vmul.f32 %v3596_v1, %v3596_v1  ;;  %v3631_v23 = vpop.f32.mrb[38].mxu0  ;;  %v3633_v27 = vpop.f32.mrb[38].mxu1 }
 0x165   :  { %5299 = vst [vmem:[#allocation57_spill] sm:$0xff] %v3633_v27  ;;  %v964_v61 = vadd.f32 %v963_v3, %v962_v45  ;;  %v1294_v59 = vadd.f32 %v1293_v41, %v3625_v21  ;;  %v1333_v19 = vmul.f32 %v3625_v21, %v3625_v21  ;;  %v1363_v38 = vadd.f32 %v1362_v48, %v1332_v63  ;;  %v3638_v51 = vpop.f32.mrb[39].mxu0  ;;  %v3640_v7 = vpop.f32.mrb[39].mxu1 }
 0x166   :  { %5300 = vst [vmem:[#allocation58_spill] sm:$0xff] %v3640_v7  ;;  %v465_v17 = vadd.f32 %v464_v32, %v463_v9  ;;  %v534_v37 = vrot.slane %v533_v43, 1  ;;  %v896_v25 = vadd.f32 %v895_v47, %v894_v11  ;;  %v1724_v56 = vadd.f32 %v3596_v1, %v1723_v28 }
 0x167   :  { %v965_v53 = vrot.slane %v964_v61, 1  ;;  %v1364_v55 = vadd.f32 %v1363_v38, %v1333_v19  ;;  %v1764_v3 = vmul.f32 %v3627_v33, %v3627_v33  ;;  %v1794_v45 = vadd.f32 %v1793_v5, %v1763_v14 }
 0x168   :  { %v535_v41 = vadd.f32 %v534_v37, %v533_v43  ;;  %v3645_v39 = vadd.f32 %v896_v25, %v465_v17  ;;  %v1725_v63 = vadd.f32 %v1724_v56, %v3627_v33  ;;  %v1295_v49 = vadd.f32 %v1294_v59, %v3638_v51 }
 0x169   :  { %v966_v48 = vadd.f32 %v965_v53, %v964_v61  ;;  %v1795_v21 = vadd.f32 %v1794_v45, %v1764_v3  ;;  %v1334_v9 = vmul.f32 %v3638_v51, %v3638_v51  ;;  %v1765_v28 = vmul.f32 %v3640_v7, %v3640_v7 }
 0x16a   :  { %v1726_v11 = vadd.f32 %v1725_v63, %v3640_v7  ;;  %v3654_v32 = vpop.f32.mrb[40].mxu0  ;;  %v3656_v5 = vpop.f32.mrb[40].mxu1  ;;  %v1335_v53 = vmul.f32 %v3618_v24, %v3618_v24  ;;  %v1296_v47 = vadd.f32 %v3618_v24, %v1295_v49  ;;  %v1766_v59 = vmul.f32 %v3620_v15, %v3620_v15 }
 0x16b   :  { %5301 = vst [vmem:[#allocation59_spill] sm:$0xff] %v3654_v32  ;;  %5302 = vst [vmem:[#allocation60_spill] sm:$0xff] %v3656_v5  ;;  %v3658_v43 = vadd.f32 %v966_v48, %v535_v41  ;;  %v3663_v14 = vpop.f32.mrb[41].mxu0  ;;  %v3665_v61 = vpop.f32.mrb[41].mxu1  ;;  %v1365_v19 = vadd.f32 %v1364_v55, %v1334_v9  ;;  %v1796_v17 = vadd.f32 %v1795_v21, %v1765_v28 }
 0x16c   :  { %5303 = vst [vmem:[#allocation61_spill] sm:$0xff] %v3663_v14  ;;  %5304 = vst [vmem:[#allocation62_spill] sm:$0xff] %v3665_v61  ;;  %v1727_v38 = vadd.f32 %v3620_v15, %v1726_v11  ;;  %v3670_v37 = vpop.f32.mrb[42].mxu0  ;;  %v3672_v25 = vpop.f32.mrb[42].mxu1  ;;  %v1336_v56 = vmul.f32 %v3631_v23, %v3631_v23  ;;  %v1767_v49 = vmul.f32 %v3633_v27, %v3633_v27 }
 0x16d   :  { %5305 = vst [vmem:[#allocation63_spill] sm:$0xff] %v3670_v37  ;;  %5306 = vst [vmem:[#allocation64_spill] sm:$0xff] %v3672_v25  ;;  %v1297_v3 = vadd.f32 %v3631_v23, %v1296_v47  ;;  %v1337_v45 = vmul.f32 %v3663_v14, %v3663_v14  ;;  %v3681_v41 = vpop.f32.mrb[43].mxu0  ;;  %v3683_v55 = vpop.f32.mrb[43].mxu1  ;;  %v1366_v21 = vadd.f32 %v1365_v19, %v1335_v53 }
 0x16e   :  { %5307 = vst [vmem:[#allocation65_spill] sm:$0xff] %v3681_v41  ;;  %5308 = vst [vmem:[#allocation66_spill] sm:$0xff] %v3683_v55  ;;  %v1797_v63 = vadd.f32 %v1796_v17, %v1766_v59  ;;  %v1728_v48 = vadd.f32 %v3633_v27, %v1727_v38  ;;  %v1768_v9 = vmul.f32 %v3665_v61, %v3665_v61 }
 0x16f   :  { %v1298_v11 = vadd.f32 %v1297_v3, %v3663_v14  ;;  %v1338_v28 = vmul.f32 %v3681_v41, %v3681_v41  ;;  %v1367_v47 = vadd.f32 %v1366_v21, %v1336_v56  ;;  %v1769_v33 = vmul.f32 %v3683_v55, %v3683_v55 }
 0x170   :  { %v1729_v15 = vadd.f32 %v1728_v48, %v3665_v61  ;;  %v1798_v7 = vadd.f32 %v1797_v63, %v1767_v49  ;;  %v1339_v3 = vmul.f32 %v3654_v32, %v3654_v32  ;;  %v1770_v63 = vmul.f32 %v3656_v5, %v3656_v5 }
 0x171   :  { %v1299_v53 = vadd.f32 %v1298_v11, %v3681_v41  ;;  %v1368_v59 = vadd.f32 %v1367_v47, %v1337_v45  ;;  %v1340_v11 = vmul.f32 %v3670_v37, %v3670_v37  ;;  %v1771_v47 = vmul.f32 %v3672_v25, %v3672_v25 }
 0x172   :  { %v1799_v19 = vadd.f32 %v1798_v7, %v1768_v9  ;;  %v1730_v38 = vadd.f32 %v1729_v15, %v3683_v55  ;;  %v3696_v17 = vpop.f32.mrb[44].mxu0  ;;  %v3698_v27 = vpop.f32.mrb[44].mxu1 }
 0x173   :  { %5309 = vst [vmem:[#allocation67_spill] sm:$0xff] %v3696_v17  ;;  %5310 = vst [vmem:[#allocation68_spill] sm:$0xff] %v3698_v27  ;;  %v1300_v56 = vadd.f32 %v3654_v32, %v1299_v53  ;;  %v3703_v21 = vpop.f32.mrb[45].mxu0  ;;  %v3705_v49 = vpop.f32.mrb[45].mxu1  ;;  %v1369_v45 = vadd.f32 %v1368_v59, %v1338_v28 }
 0x174   :  { %5311 = vst [vmem:[#allocation69_spill] sm:$0xff] %v3703_v21  ;;  %5312 = vst [vmem:[#allocation70_spill] sm:$0xff] %v3705_v49  ;;  %v1731_v7 = vadd.f32 %v3656_v5, %v1730_v38  ;;  %v1800_v15 = vadd.f32 %v1799_v19, %v1769_v33  ;;  %v3710_v48 = vpop.f32.mrb[46].mxu0  ;;  %v3712_v9 = vpop.f32.mrb[46].mxu1  ;;  %v1341_v55 = vmul.f32 %v3703_v21, %v3703_v21 }
 0x175   :  { %5313 = vst [vmem:[#allocation71_spill] sm:$0xff] %v3710_v48  ;;  %5314 = vst [vmem:[#allocation72_spill] sm:$0xff] %v3712_v9  ;;  %v1301_v53 = vadd.f32 %v3670_v37, %v1300_v56  ;;  %v3721_v61 = vpop.f32.mrb[47].mxu0  ;;  %v3723_v28 = vpop.f32.mrb[47].mxu1  ;;  %v1370_v33 = vadd.f32 %v1369_v45, %v1339_v3  ;;  %v1772_v38 = vmul.f32 %v3705_v49, %v3705_v49 }
 0x176   :  { %5315 = vst [vmem:[#allocation73_spill] sm:$0xff] %v3721_v61  ;;  %5316 = vst [vmem:[#allocation74_spill] sm:$0xff] %v3723_v28  ;;  %v1801_v59 = vadd.f32 %v1800_v15, %v1770_v63  ;;  %v1732_v19 = vadd.f32 %v3672_v25, %v1731_v7  ;;  %v1342_v1 = vmul.f32 %v3721_v61, %v3721_v61 }
 0x177   :  { %v1302_v5 = vadd.f32 %v1301_v53, %v3703_v21  ;;  %v1371_v56 = vadd.f32 %v1370_v33, %v1340_v11  ;;  %v1773_v41 = vmul.f32 %v3723_v28, %v3723_v28  ;;  %v1343_v53 = vmul.f32 %v3696_v17, %v3696_v17 }
 0x178   :  { %v1733_v37 = vadd.f32 %v1732_v19, %v3705_v49  ;;  %v1802_v32 = vadd.f32 %v1801_v59, %v1771_v47 }
 0x179   :  { %v1303_v3 = vadd.f32 %v1302_v5, %v3721_v61  ;;  %v1372_v63 = vadd.f32 %v1371_v56, %v1341_v55  ;;  %v1774_v5 = vmul.f32 %v3698_v27, %v3698_v27  ;;  %v1775_v56 = vmul.f32 %v3712_v9, %v3712_v9 }
 0x17a   :  { %v1803_v45 = vadd.f32 %v1802_v32, %v1772_v38  ;;  %v1734_v7 = vadd.f32 %v1733_v37, %v3723_v28  ;;  %v3736_v15 = vpop.f32.mrb[48].mxu0  ;;  %v3738_v25 = vpop.f32.mrb[48].mxu1  ;;  %v1344_v38 = vmul.f32 %v3710_v48, %v3710_v48 }
 0x17b   :  { %5317 = vst [vmem:[#allocation75_spill] sm:$0xff] %v3736_v15  ;;  %5318 = vst [vmem:[#allocation76_spill] sm:$0xff] %v3738_v25  ;;  %v1304_v11 = vadd.f32 %v3696_v17, %v1303_v3  ;;  %v3743_v33 = vpop.f32.mrb[49].mxu0  ;;  %v3745_v47 = vpop.f32.mrb[49].mxu1  ;;  %v1373_v55 = vadd.f32 %v1372_v63, %v1342_v1 }
 0x17c   :  { %5319 = vst [vmem:[#allocation77_spill] sm:$0xff] %v3743_v33  ;;  %5320 = vst [vmem:[#allocation78_spill] sm:$0xff] %v3745_v47  ;;  %v1735_v32 = vadd.f32 %v3698_v27, %v1734_v7  ;;  %v1804_v37 = vadd.f32 %v1803_v45, %v1773_v41  ;;  %v3750_v59 = vpop.f32.mrb[50].mxu0  ;;  %v3752_v19 = vpop.f32.mrb[50].mxu1  ;;  %v1345_v28 = vmul.f32 %v3743_v33, %v3743_v33 }
 0x17d   :  { %5321 = vst [vmem:[#allocation79_spill] sm:$0xff] %v3750_v59  ;;  %5322 = vst [vmem:[#allocation80_spill] sm:$0xff] %v3752_v19  ;;  %v1305_v3 = vadd.f32 %v3710_v48, %v1304_v11  ;;  %v3761_v49 = vpop.f32.mrb[51].mxu0  ;;  %v3763_v1 = vpop.f32.mrb[51].mxu1  ;;  %v1374_v41 = vadd.f32 %v1373_v55, %v1343_v53  ;;  %v1776_v7 = vmul.f32 %v3745_v47, %v3745_v47 }
 0x17e   :  { %5323 = vst [vmem:[#allocation81_spill] sm:$0xff] %v3761_v49  ;;  %5324 = vst [vmem:[#allocation82_spill] sm:$0xff] %v3763_v1  ;;  %v1805_v63 = vadd.f32 %v1804_v37, %v1774_v5  ;;  %v1736_v45 = vadd.f32 %v3712_v9, %v1735_v32  ;;  %v1346_v17 = vmul.f32 %v3761_v49, %v3761_v49 }
 0x17f   :  { %v1306_v27 = vadd.f32 %v1305_v3, %v3743_v33  ;;  %v1375_v11 = vadd.f32 %v1374_v41, %v1344_v38  ;;  %v1777_v21 = vmul.f32 %v3763_v1, %v3763_v1  ;;  %v1347_v3 = vmul.f32 %v3736_v15, %v3736_v15 }
 0x180   :  { %v1737_v48 = vadd.f32 %v1736_v45, %v3745_v47  ;;  %v1806_v61 = vadd.f32 %v1805_v63, %v1775_v56 }
 0x181   :  { %v1307_v53 = vadd.f32 %v1306_v27, %v3761_v49  ;;  %v1376_v5 = vadd.f32 %v1375_v11, %v1345_v28  ;;  %v1778_v27 = vmul.f32 %v3738_v25, %v3738_v25  ;;  %v1779_v11 = vmul.f32 %v3752_v19, %v3752_v19 }
 0x182   :  { %v1807_v55 = vadd.f32 %v1806_v61, %v1776_v7  ;;  %v1738_v32 = vadd.f32 %v1737_v48, %v3763_v1  ;;  %v3776_v37 = vpop.f32.mrb[52].mxu0  ;;  %v3778_v9 = vpop.f32.mrb[52].mxu1  ;;  %v1348_v7 = vmul.f32 %v3750_v59, %v3750_v59 }
 0x183   :  { %5325 = vst [vmem:[#allocation83_spill] sm:$0xff] %v3776_v37  ;;  %5326 = vst [vmem:[#allocation84_spill] sm:$0xff] %v3778_v9  ;;  %v1308_v38 = vadd.f32 %v3736_v15, %v1307_v53  ;;  %v3783_v41 = vpop.f32.mrb[53].mxu0  ;;  %v3785_v56 = vpop.f32.mrb[53].mxu1  ;;  %v1377_v28 = vadd.f32 %v1376_v5, %v1346_v17 }
 0x184   :  { %5327 = vst [vmem:[#allocation85_spill] sm:$0xff] %v3783_v41  ;;  %5328 = vst [vmem:[#allocation86_spill] sm:$0xff] %v3785_v56  ;;  %v1739_v61 = vadd.f32 %v3738_v25, %v1738_v32  ;;  %v1808_v48 = vadd.f32 %v1807_v55, %v1777_v21  ;;  %v3790_v63 = vpop.f32.mrb[54].mxu0  ;;  %v3792_v45 = vpop.f32.mrb[54].mxu1  ;;  %v1349_v1 = vmul.f32 %v3783_v41, %v3783_v41 }
 0x185   :  { %5329 = vst [vmem:[#allocation87_spill] sm:$0xff] %v3790_v63  ;;  %5330 = vst [vmem:[#allocation88_spill] sm:$0xff] %v3792_v45  ;;  %v1309_v53 = vadd.f32 %v3750_v59, %v1308_v38  ;;  %v3801_v47 = vpop.f32.mrb[55].mxu0  ;;  %v3803_v17 = vpop.f32.mrb[55].mxu1  ;;  %v1378_v21 = vadd.f32 %v1377_v28, %v1347_v3  ;;  %v1780_v32 = vmul.f32 %v3785_v56, %v3785_v56 }
 0x186   :  { %5331 = vst [vmem:[#allocation89_spill] sm:$0xff] %v3801_v47  ;;  %5332 = vst [vmem:[#allocation90_spill] sm:$0xff] %v3803_v17  ;;  %v1809_v5 = vadd.f32 %v1808_v48, %v1778_v27  ;;  %v1740_v55 = vadd.f32 %v3752_v19, %v1739_v61  ;;  %v1350_v15 = vmul.f32 %v3801_v47, %v3801_v47 }
 0x187   :  { %v1310_v25 = vadd.f32 %v1309_v53, %v3783_v41  ;;  %v1379_v38 = vadd.f32 %v1378_v21, %v1348_v7  ;;  %v1781_v33 = vmul.f32 %v3803_v17, %v3803_v17  ;;  %v1351_v53 = vmul.f32 %v3776_v37, %v3776_v37 }
 0x188   :  { %v1741_v59 = vadd.f32 %v1740_v55, %v3785_v56  ;;  %v1810_v49 = vadd.f32 %v1809_v5, %v1779_v11 }
 0x189   :  { %v1311_v3 = vadd.f32 %v1310_v25, %v3801_v47  ;;  %v1380_v27 = vadd.f32 %v1379_v38, %v1349_v1  ;;  %v1782_v25 = vmul.f32 %v3778_v9, %v3778_v9  ;;  %v1783_v38 = vmul.f32 %v3792_v45, %v3792_v45 }
 0x18a   :  { %v1811_v28 = vadd.f32 %v1810_v49, %v1780_v32  ;;  %v1742_v61 = vadd.f32 %v1741_v59, %v3803_v17  ;;  %v3816_v48 = vpop.f32.mrb[56].mxu0  ;;  %v3818_v19 = vpop.f32.mrb[56].mxu1  ;;  %v1352_v32 = vmul.f32 %v3790_v63, %v3790_v63 }
 0x18b   :  { %5333 = vst [vmem:[#allocation91_spill] sm:$0xff] %v3816_v48  ;;  %5334 = vst [vmem:[#allocation92_spill] sm:$0xff] %v3818_v19  ;;  %v1312_v7 = vadd.f32 %v3776_v37, %v1311_v3  ;;  %v3823_v21 = vpop.f32.mrb[57].mxu0  ;;  %v3825_v11 = vpop.f32.mrb[57].mxu1  ;;  %v1381_v1 = vadd.f32 %v1380_v27, %v1350_v15 }
 0x18c   :  { %5335 = vst [vmem:[#allocation93_spill] sm:$0xff] %v3823_v21  ;;  %5336 = vst [vmem:[#allocation94_spill] sm:$0xff] %v3825_v11  ;;  %v1743_v49 = vadd.f32 %v3778_v9, %v1742_v61  ;;  %v1812_v59 = vadd.f32 %v1811_v28, %v1781_v33  ;;  %v3830_v5 = vpop.f32.mrb[58].mxu0  ;;  %v3832_v55 = vpop.f32.mrb[58].mxu1  ;;  %v1353_v17 = vmul.f32 %v3823_v21, %v3823_v21 }
 0x18d   :  { %5337 = vst [vmem:[#allocation95_spill] sm:$0xff] %v3830_v5  ;;  %5338 = vst [vmem:[#allocation96_spill] sm:$0xff] %v3832_v55  ;;  %v1313_v3 = vadd.f32 %v3790_v63, %v1312_v7  ;;  %v3841_v56 = vpop.f32.mrb[59].mxu0  ;;  %v3843_v15 = vpop.f32.mrb[59].mxu1  ;;  %v1382_v33 = vadd.f32 %v1381_v1, %v1351_v53  ;;  %v1784_v61 = vmul.f32 %v3825_v11, %v3825_v11 }
 0x18e   :  { %5339 = vst [vmem:[#allocation97_spill] sm:$0xff] %v3841_v56  ;;  %5340 = vst [vmem:[#allocation98_spill] sm:$0xff] %v3843_v15  ;;  %v1813_v27 = vadd.f32 %v1812_v59, %v1782_v25  ;;  %v1744_v28 = vadd.f32 %v3792_v45, %v1743_v49  ;;  %v1354_v37 = vmul.f32 %v3841_v56, %v3841_v56 }
 0x18f   :  { %v1314_v9 = vadd.f32 %v1313_v3, %v3823_v21  ;;  %v1383_v7 = vadd.f32 %v1382_v33, %v1352_v32  ;;  %v1785_v41 = vmul.f32 %v3843_v15, %v3843_v15  ;;  %v1355_v3 = vmul.f32 %v3816_v48, %v3816_v48 }
 0x190   :  { %v1745_v63 = vadd.f32 %v1744_v28, %v3825_v11  ;;  %v1814_v47 = vadd.f32 %v1813_v27, %v1783_v38 }
 0x191   :  { %v1315_v53 = vadd.f32 %v1314_v9, %v3841_v56  ;;  %v1384_v25 = vadd.f32 %v1383_v7, %v1353_v17  ;;  %v1786_v9 = vmul.f32 %v3818_v19, %v3818_v19  ;;  %v1787_v7 = vmul.f32 %v3832_v55, %v3832_v55 }
 0x192   :  { %v1815_v1 = vadd.f32 %v1814_v47, %v1784_v61  ;;  %v1746_v49 = vadd.f32 %v1745_v63, %v3843_v15  ;;  %v3856_v59 = vpop.f32.mrb[60].mxu0  ;;  %v3858_v45 = vpop.f32.mrb[60].mxu1  ;;  %v1356_v61 = vmul.f32 %v3830_v5, %v3830_v5 }
 0x193   :  { %5341 = vst [vmem:[#allocation99_spill] sm:$0xff] %v3856_v59  ;;  %5342 = vst [vmem:[#allocation100_spill] sm:$0xff] %v3858_v45  ;;  %v1316_v32 = vadd.f32 %v3816_v48, %v1315_v53  ;;  %v3863_v33 = vpop.f32.mrb[61].mxu0  ;;  %v3865_v38 = vpop.f32.mrb[61].mxu1  ;;  %v1385_v17 = vadd.f32 %v1384_v25, %v1354_v37 }
 0x194   :  { %5343 = vst [vmem:[#allocation101_spill] sm:$0xff] %v3863_v33  ;;  %5344 = vst [vmem:[#allocation102_spill] sm:$0xff] %v3865_v38  ;;  %v1747_v47 = vadd.f32 %v3818_v19, %v1746_v49  ;;  %v1816_v63 = vadd.f32 %v1815_v1, %v1785_v41  ;;  %v3870_v27 = vpop.f32.mrb[62].mxu0  ;;  %v3872_v28 = vpop.f32.mrb[62].mxu1  ;;  %v1357_v15 = vmul.f32 %v3863_v33, %v3863_v33 }
 0x195   :  { %5345 = vst [vmem:[#allocation103_spill] sm:$0xff] %v3870_v27  ;;  %v1317_v53 = vadd.f32 %v3830_v5, %v1316_v32  ;;  %v3881_v11 = vpop.f32.mrb[63].mxu0  ;;  %v3883_v37 = vpop.f32.mrb[63].mxu1  ;;  %v1386_v41 = vadd.f32 %v1385_v17, %v1355_v3  ;;  %v1788_v49 = vmul.f32 %v3865_v38, %v3865_v38 }
 0x196   :  { %5346 = vst [vmem:[#allocation104_spill] sm:$0xff] %v3881_v11  ;;  %v1817_v25 = vadd.f32 %v1816_v63, %v1786_v9  ;;  %v1748_v1 = vadd.f32 %v3832_v55, %v1747_v47  ;;  %v1358_v48 = vmul.f32 %v3881_v11, %v3881_v11  ;;  %v1789_v21 = vmul.f32 %v3883_v37, %v3883_v37 }
 0x197   :  { %v1318_v19 = vadd.f32 %v1317_v53, %v3863_v33  ;;  %v1387_v32 = vadd.f32 %v1386_v41, %v1356_v61  ;;  %v1359_v63 = vmul.f32 %v3856_v59, %v3856_v59  ;;  %v1790_v61 = vmul.f32 %v3858_v45, %v3858_v45 }
 0x198   :  { %v1749_v5 = vadd.f32 %v1748_v1, %v3865_v38  ;;  %v1818_v56 = vadd.f32 %v1817_v25, %v1787_v7  ;;  %v1360_v1 = vmul.f32 %v3870_v27, %v3870_v27 }
 0x199   :  { %v1319_v3 = vadd.f32 %v1318_v19, %v3881_v11  ;;  %v1388_v9 = vadd.f32 %v1387_v32, %v1357_v15 }
 0x19a   :  { %v1819_v17 = vadd.f32 %v1818_v56, %v1788_v49  ;;  %v1750_v47 = vadd.f32 %v1749_v5, %v3883_v37  ;;  %v1791_v56 = vmul.f32 %v3872_v28, %v3872_v28 }
 0x19b   :  { %v1320_v53 = vadd.f32 %v3856_v59, %v1319_v3  ;;  %v1389_v41 = vadd.f32 %v1388_v9, %v1358_v48 }
 0x19c   :  { %v1751_v7 = vadd.f32 %v3858_v45, %v1750_v47  ;;  %v1820_v25 = vadd.f32 %v1819_v17, %v1789_v21 }
 0x19d   :  { %v1321_v19 = vadd.f32 %v3870_v27, %v1320_v53  ;;  %v1390_v5 = vadd.f32 %v1389_v41, %v1359_v63 }
 0x19e   :  { %v1752_v15 = vadd.f32 %v3872_v28, %v1751_v7  ;;  %v1821_v49 = vadd.f32 %v1820_v25, %v1790_v61 }
 0x19f   :  { %v1322_v32 = vrot.slane %v1321_v19, 4  ;;  %v1391_v3 = vadd.f32 %v1390_v5, %v1360_v1 }
 0x1a0   :  { %v1753_v38 = vrot.slane %v1752_v15, 4  ;;  %v1822_v55 = vadd.f32 %v1821_v49, %v1791_v56 }
 0x1a1   :  { %v1323_v48 = vadd.f32 %v1322_v32, %v1321_v19  ;;  %v1392_v9 = vrot.slane %v1391_v3, 4 }
 0x1a2   :  { %v1754_v47 = vadd.f32 %v1753_v38, %v1752_v15  ;;  %v1823_v21 = vrot.slane %v1822_v55, 4 }
 0x1a3   :  { %v1324_v17 = vrot.slane %v1323_v48, 2  ;;  %v1393_v45 = vadd.f32 %v1392_v9, %v1391_v3 }
 0x1a4   :  { %v1755_v59 = vrot.slane %v1754_v47, 2  ;;  %v1824_v11 = vadd.f32 %v1823_v21, %v1822_v55 }
 0x1a5   :  { %v1325_v53 = vadd.f32 %v1324_v17, %v1323_v48  ;;  %v1394_v27 = vrot.slane %v1393_v45, 2 }
 0x1a6   :  { %v1756_v33 = vadd.f32 %v1755_v59, %v1754_v47  ;;  %v1825_v14 = vrot.slane %v1824_v11, 2 }
 0x1a7   :  { %v1326_v63 = vrot.slane %v1325_v53, 1  ;;  %v1395_v41 = vadd.f32 %v1394_v27, %v1393_v45  ;;  %v1875_v45 = vlaneseq }
 0x1a8   :  { %v1757_v7 = vrot.slane %v1756_v33, 1  ;;  %v1826_v61 = vadd.f32 %v1825_v14, %v1824_v11  ;;  %v1834_v11 = vld [vmem:[%s5159_s2] sm:$0x3]  ;;  %s3157_s2 = smov [#allocation8]  }
 0x1a9   :  { %v1327_v25 = vadd.f32 %v1326_v63, %v1325_v53  ;;  %v1396_v1 = vrot.slane %v1395_v41, 1  ;;  %v1876_v14 = vshrl.u32 %v1875_v45, 7  ;;  %v5355_v45 = vld [vmem:[#allocation19_spill] sm:$0xff]  ;;  %s2627_s11 = sshll.u32 %s3157_s2, 4  ;;  %s5134_s11 = int_to_ptr.vmem [resolvable:$true] %s2627_s11 }
 0x1aa   :  { %v1827_v5 = vrot.slane %v1826_v61, 1  ;;  %v1758_v56 = vadd.f32 %v1757_v7, %v1756_v33  ;;  %s3125_s12 = scalar_lea.vmem %s5134_s11, 16384  ;;  %p3130_p3 = scmp.lt.s32.totalorder %s5134_s11, %s5134_s11 }
 0x1ab   :  { %v1328_v19 = vadd.f32 %v1327_v25, %v3645_v39  ;;  %v1397_v38 = vadd.f32 %v1396_v1, %v1395_v41  ;;  %v1877_v39 = vsub.s32 0, %v1876_v14  ;;  %p3126_p2 = scmp.ne.s32.totalorder %s5134_s11, %s3125_s12  ;;  %p3131_p4 = scmp.lt.s32.totalorder %s3125_s12, %s3125_s12 }
 0x1ac   :  { %v1828_v32 = vadd.f32 %v1827_v5, %v1826_v61 }
 0x1ad   :  { %v1759_v15 = vadd.f32 %v1758_v56, %v1328_v19  ;;  %v1398_v49 = vadd.f32 %v1397_v38, %v3658_v43  ;;  %v1913_v43 = vsub.s32 1, %v1876_v14  ;;  %p3132_p5 = por %p3131_p4, %p3130_p3 }
 0x1af   :  { %v1830_v55 = vmul.f32 0.0009765625, %v1759_v15  ;;  %v1829_v3 = vadd.f32 %v1828_v32, %v1398_v49  ;;  %v5349_v49 = vld [vmem:[#allocation13_spill] sm:$0xff]  ;;  %v5350_v32 = vld [vmem:[#allocation15_spill] sm:$0xff]  ;;  %p3133_p6 = pnand %p3132_p5, %p3126_p2 }
 0x1b1   :  { %v1832_v48 = vmul.f32 %v1830_v55, %v1830_v55  ;;  %v1831_v59 = vmul.f32 0.0009765625, %v1829_v3 }
 0x1b3   :  { %v1833_v9 = vsub.f32 %v1831_v59, %v1832_v48  ;;  %v5352_v48 = vld [vmem:[#allocation14_spill] sm:$0xff] }
 0x1b5   :  { %v1835_v47 = vadd.f32 1e-05, %v1833_v9  ;;  %v5353_v9 = vld [vmem:[#allocation17_spill] sm:$0xff] }
 0x1b7   :  { %3079 = vrsqrt.f32 %v1835_v47 }
 0x1c1   :  { %v3080_v33 = vpop.eup %3079 }
 0x1c2   :  { %v1837_v27 = vmul.f32 %v3080_v33, %v1834_v11  ;;  %v5359_v33 = vld [vmem:[#allocation18_spill] sm:$0xff] }
 0x1c4   :  { %v1838_v21 = vmul.f32 %v1837_v27, %v1830_v55  ;;  %v3913_v17 = vrot.slane %v1837_v27, %v1877_v39 }
 0x1c6   :  { %v1840_v53 = vrot.slane %v1838_v21, 7  ;;  %v2490_v63 = vmul.f32 %v3913_v17, %v3883_v37  ;;  %v3919_v41 = vmul.f32 %v3913_v17, %v3268_v10  ;;  %v3923_v7 = vmul.f32 %v3913_v17, %v3280_v16  ;;  %v5361_v21 = vld [vmem:[#allocation21_spill] sm:$0xff] }
 0x1c7   :  { %v3927_v61 = vmul.f32 %v3264_v8, %v3913_v17  ;;  %v3931_v25 = vmul.f32 %v3274_v13, %v3913_v17  ;;  %v3935_v1 = vmul.f32 %v3913_v17, %v3308_v36  ;;  %v3939_v10 = vmul.f32 %v3913_v17, %v3322_v46 }
 0x1c8   :  { %v1842_v37 = vsub.f32 %v1834_v11, %v1840_v53  ;;  %v3943_v16 = vmul.f32 %v3300_v31, %v3913_v17  ;;  %v3947_v8 = vmul.f32 %v3316_v42, %v3913_v17  ;;  %v3951_v13 = vmul.f32 %v3913_v17, %v3348_v4  ;;  %v5357_v11 = vld [vmem:[#allocation16_spill] sm:$0xff]  ;;  %v5363_v53 = vld [vmem:[#allocation23_spill] sm:$0xff] }
 0x1c9   :  { %v3955_v36 = vmul.f32 %v3913_v17, %v3362_v22  ;;  %v3959_v46 = vmul.f32 %v3340_v62, %v3913_v17  ;;  %v3963_v31 = vmul.f32 %v3356_v18, %v3913_v17  ;;  %v3967_v42 = vmul.f32 %v3913_v17, %v3388_v52 }
 0x1ca   :  { %v3969_v5 = vrot.slane %v1842_v37, %v1913_v43  ;;  %v3973_v4 = vmul.f32 %v3913_v17, %v3402_v0  ;;  %v3977_v22 = vmul.f32 %v3380_v44, %v3913_v17  ;;  %v3981_v62 = vmul.f32 %v3396_v58, %v3913_v17  ;;  %v5365_v37 = vld [vmem:[#allocation20_spill] sm:$0xff] }
 0x1cb   :  { %v3985_v18 = vmul.f32 %v3913_v17, %v3428_v40  ;;  %v3989_v52 = vmul.f32 %v3913_v17, %v3442_v60  ;;  %v3993_v0 = vmul.f32 %v3420_v30, %v3913_v17  ;;  %v3997_v44 = vmul.f32 %v3436_v54, %v3913_v17 }
 0x1cc   :  { %v2522_v19 = vadd.f32 %v2490_v63, %v3969_v5  ;;  %v4002_v58 = vmul.f32 %v3913_v17, %v3468_v50  ;;  %v4006_v40 = vmul.f32 %v3913_v17, %v3482_v20  ;;  %v4010_v60 = vmul.f32 %v3460_v34, %v3913_v17 }
 0x1cd   :  { %v4014_v30 = vmul.f32 %v3476_v6, %v3913_v17  ;;  %v4018_v54 = vmul.f32 %v3913_v17, %v3508_v26  ;;  %v4022_v50 = vmul.f32 %v3913_v17, %v3522_v57  ;;  %v4026_v20 = vmul.f32 %v3500_v12, %v3913_v17  ;;  %v5347_v57 = vld [vmem:[#allocation40_spill] sm:$0xff]  ;;  %v5348_v12 = vld [vmem:[#allocation43_spill] sm:$0xff] }
 0x1ce   :  { %v2554_v56 = vmul.f32 0.2, %v2522_v19  ;;  %v4030_v34 = vmul.f32 %v3516_v35, %v3913_v17  ;;  %v4034_v6 = vmul.f32 %v3913_v17, %v3548_v2  ;;  %v4038_v26 = vmul.f32 %v3913_v17, %v3562_v29  ;;  %v5351_v29 = vld [vmem:[#allocation12_spill] sm:$0xff] }
 0x1cf   :  { %v4042_v38 = vmul.f32 %v5347_v57, %v3913_v17  ;;  %v4046_v15 = vmul.f32 %v5348_v12, %v3913_v17  ;;  %v4050_v35 = vmul.f32 %v3913_v17, %v5349_v49  ;;  %v4054_v2 = vmul.f32 %v3913_v17, %v5350_v32  ;;  %v5369_v12 = vld [vmem:[#allocation25_spill] sm:$0xff]  ;;  %v5371_v32 = vld [vmem:[#allocation27_spill] sm:$0xff] }
 0x1d0   :  { %v2586_v55 = vmax.f32 %v2522_v19, %v2554_v56  ;;  %v4058_v3 = vmul.f32 %v5351_v29, %v3913_v17  ;;  %v4062_v59 = vmul.f32 %v5352_v48, %v3913_v17  ;;  %v4066_v47 = vmul.f32 %v3913_v17, %v5353_v9  ;;  %v5367_v56 = vld [vmem:[#allocation22_spill] sm:$0xff] }
 0x1d1   :  { %v4070_v14 = vmul.f32 %v3913_v17, %v5355_v45  ;;  %v4074_v39 = vmul.f32 %v5357_v11, %v3913_v17  ;;  %v4078_v27 = vmul.f32 %v5359_v33, %v3913_v17  ;;  %v4082_v43 = vmul.f32 %v3913_v17, %v5361_v21  ;;  %v5375_v9 = vld [vmem:[#allocation26_spill] sm:$0xff]  ;;  %v5377_v11 = vld [vmem:[#allocation29_spill] sm:$0xff]  ;;  %v5379_v21 = vld [vmem:[#allocation31_spill] sm:$0xff] }
 0x1d2   :  { %5354 = vst [vmem:[#allocation40_spill] sm:$0xff] %v4066_v47  ;;  %2619 = vst [vmem:[#allocation8 + $0x3e8] sm:$0xff] %v2586_v55  ;;  %v4086_v63 = vmul.f32 %v3913_v17, %v5363_v53  ;;  %v4090_v19 = vmul.f32 %v5365_v37, %v3913_v17  ;;  %v4094_v57 = vmul.f32 %v5367_v56, %v3913_v17  ;;  %v5373_v55 = vld [vmem:[#allocation24_spill] sm:$0xff] }
 0x1d3   :  { %5356 = vst [vmem:[#allocation43_spill] sm:$0xff] %v4070_v14  ;;  %5358 = vst [vmem:[#allocation13_spill] sm:$0xff] %v4074_v39  ;;  %v4098_v49 = vmul.f32 %v3913_v17, %v5369_v12  ;;  %v4102_v29 = vmul.f32 %v3913_v17, %v5371_v32  ;;  %v4106_v48 = vmul.f32 %v5373_v55, %v3913_v17  ;;  %v5381_v37 = vld [vmem:[#allocation28_spill] sm:$0xff]  ;;  %v5383_v12 = vld [vmem:[#allocation30_spill] sm:$0xff] }
 0x1d4   :  { %5360 = vst [vmem:[#allocation15_spill] sm:$0xff] %v4078_v27  ;;  %5362 = vst [vmem:[#allocation12_spill] sm:$0xff] %v4082_v43  ;;  %v4110_v45 = vmul.f32 %v5375_v9, %v3913_v17  ;;  %v4114_v33 = vmul.f32 %v3913_v17, %v5377_v11  ;;  %v4118_v53 = vmul.f32 %v3913_v17, %v5379_v21  ;;  %v5385_v55 = vld [vmem:[#allocation33_spill] sm:$0xff] }
 0x1d5   :  { %5364 = vst [vmem:[#allocation14_spill] sm:$0xff] %v4086_v63  ;;  %5366 = vst [vmem:[#allocation17_spill] sm:$0xff] %v4090_v19  ;;  %v4122_v56 = vmul.f32 %v5381_v37, %v3913_v17  ;;  %v4126_v32 = vmul.f32 %v5383_v12, %v3913_v17  ;;  %v4130_v9 = vmul.f32 %v3913_v17, %v5385_v55 }
 0x1d6   :  { %5368 = vst [vmem:[#allocation19_spill] sm:$0xff] %v4094_v57  ;;  %5370 = vst [vmem:[#allocation16_spill] sm:$0xff] %v4098_v49 }
 0x1d7   :  { %5372 = vst [vmem:[#allocation18_spill] sm:$0xff] %v4102_v29  ;;  %5374 = vst [vmem:[#allocation21_spill] sm:$0xff] %v4106_v48 }
 0x1d8   :  { %5376 = vst [vmem:[#allocation23_spill] sm:$0xff] %v4110_v45  ;;  %5378 = vst [vmem:[#allocation20_spill] sm:$0xff] %v4114_v33  ;;  %v5387_v45 = vld [vmem:[#allocation35_spill] sm:$0xff]  ;;  %v5389_v33 = vld [vmem:[#allocation32_spill] sm:$0xff] }
 0x1d9   :  { %5380 = vst [vmem:[#allocation22_spill] sm:$0xff] %v4118_v53  ;;  %5382 = vst [vmem:[#allocation25_spill] sm:$0xff] %v4122_v56  ;;  %v4134_v11 = vmul.f32 %v3913_v17, %v5387_v45  ;;  %v4138_v21 = vmul.f32 %v5389_v33, %v3913_v17  ;;  %v5391_v53 = vld [vmem:[#allocation34_spill] sm:$0xff]  ;;  %v5393_v56 = vld [vmem:[#allocation37_spill] sm:$0xff] }
 0x1da   :  { %5384 = vst [vmem:[#allocation27_spill] sm:$0xff] %v4126_v32  ;;  %5386 = vst [vmem:[#allocation24_spill] sm:$0xff] %v4130_v9  ;;  %v4142_v37 = vmul.f32 %v5391_v53, %v3913_v17  ;;  %v4146_v12 = vmul.f32 %v3913_v17, %v5393_v56  ;;  %v5395_v32 = vld [vmem:[#allocation39_spill] sm:$0xff]  ;;  %v5397_v9 = vld [vmem:[#allocation36_spill] sm:$0xff] }
 0x1db   :  { %5388 = vst [vmem:[#allocation26_spill] sm:$0xff] %v4134_v11  ;;  %5390 = vst [vmem:[#allocation29_spill] sm:$0xff] %v4138_v21  ;;  %v4150_v55 = vmul.f32 %v3913_v17, %v5395_v32  ;;  %v4154_v45 = vmul.f32 %v5397_v9, %v3913_v17  ;;  %v5399_v11 = vld [vmem:[#allocation38_spill] sm:$0xff] }
 0x1dc   :  { %5392 = vst [vmem:[#allocation31_spill] sm:$0xff] %v4142_v37  ;;  %5394 = vst [vmem:[#allocation28_spill] sm:$0xff] %v4146_v12  ;;  %v4158_v33 = vmul.f32 %v5399_v11, %v3913_v17  ;;  %v5401_v21 = vld [vmem:[#allocation42_spill] sm:$0xff]  ;;  %v5403_v37 = vld [vmem:[#allocation45_spill] sm:$0xff] }
 0x1dd   :  { %5396 = vst [vmem:[#allocation30_spill] sm:$0xff] %v4150_v55  ;;  %5398 = vst [vmem:[#allocation33_spill] sm:$0xff] %v4154_v45  ;;  %v4162_v53 = vmul.f32 %v3913_v17, %v5401_v21  ;;  %v4166_v56 = vmul.f32 %v3913_v17, %v5403_v37  ;;  %v5405_v12 = vld [vmem:[#allocation41_spill] sm:$0xff]  ;;  %v5407_v55 = vld [vmem:[#allocation44_spill] sm:$0xff] }
 0x1de   :  { %5400 = vst [vmem:[#allocation35_spill] sm:$0xff] %v4158_v33  ;;  %v4170_v32 = vmul.f32 %v5405_v12, %v3913_v17  ;;  %v4174_v9 = vmul.f32 %v5407_v55, %v3913_v17  ;;  %v5409_v45 = vld [vmem:[#allocation48_spill] sm:$0xff] }
 0x1df   :  { %5402 = vst [vmem:[#allocation32_spill] sm:$0xff] %v4162_v53  ;;  %5404 = vst [vmem:[#allocation34_spill] sm:$0xff] %v4166_v56  ;;  %v4178_v11 = vmul.f32 %v3913_v17, %v5409_v45  ;;  %v5411_v33 = vld [vmem:[#allocation52_spill] sm:$0xff]  ;;  %v5413_v53 = vld [vmem:[#allocation46_spill] sm:$0xff]  ;;  %v4198_v45 = vmul.f32 %v3913_v17, %v3638_v51 }
 0x1e0   :  { %5406 = vst [vmem:[#allocation37_spill] sm:$0xff] %v4170_v32  ;;  %5408 = vst [vmem:[#allocation39_spill] sm:$0xff] %v4174_v9  ;;  %v4182_v21 = vmul.f32 %v3913_v17, %v5411_v33  ;;  %v4186_v37 = vmul.f32 %v5413_v53, %v3913_v17  ;;  %v5415_v56 = vld [vmem:[#allocation50_spill] sm:$0xff]  ;;  %v5417_v32 = vld [vmem:[#allocation55_spill] sm:$0xff]  ;;  %v4202_v33 = vmul.f32 %v3618_v24, %v3913_v17 }
 0x1e1   :  { %5410 = vst [vmem:[#allocation36_spill] sm:$0xff] %v4178_v11  ;;  %v4190_v12 = vmul.f32 %v5415_v56, %v3913_v17  ;;  %v4194_v55 = vmul.f32 %v3913_v17, %v5417_v32  ;;  %5419 = vst [vmem:[#allocation44_spill] sm:$0xff] %v4198_v45  ;;  %v4206_v53 = vmul.f32 %v3631_v23, %v3913_v17  ;;  %v5428_v45 = vld [vmem:[#allocation63_spill] sm:$0xff] }
 0x1e2   :  { %5412 = vst [vmem:[#allocation38_spill] sm:$0xff] %v4182_v21  ;;  %5414 = vst [vmem:[#allocation42_spill] sm:$0xff] %v4186_v37  ;;  %v5422_v37 = vld [vmem:[#allocation61_spill] sm:$0xff]  ;;  %v4222_v24 = vmul.f32 %v5428_v45, %v3913_v17 }
 0x1e3   :  { %5416 = vst [vmem:[#allocation45_spill] sm:$0xff] %v4190_v12  ;;  %5418 = vst [vmem:[#allocation41_spill] sm:$0xff] %v4194_v55  ;;  %v4210_v56 = vmul.f32 %v3913_v17, %v5422_v37  ;;  %v5424_v12 = vld [vmem:[#allocation65_spill] sm:$0xff]  ;;  %v5426_v55 = vld [vmem:[#allocation59_spill] sm:$0xff] }
 0x1e4   :  { %5420 = vst [vmem:[#allocation48_spill] sm:$0xff] %v4202_v33  ;;  %5421 = vst [vmem:[#allocation52_spill] sm:$0xff] %v4206_v53  ;;  %v4214_v32 = vmul.f32 %v3913_v17, %v5424_v12  ;;  %v4218_v51 = vmul.f32 %v5426_v55, %v3913_v17  ;;  %v5430_v33 = vld [vmem:[#allocation69_spill] sm:$0xff] }
 0x1e5   :  { %5423 = vst [vmem:[#allocation46_spill] sm:$0xff] %v4210_v56  ;;  %5429 = vst [vmem:[#allocation61_spill] sm:$0xff] %v4222_v24  ;;  %v4226_v23 = vmul.f32 %v3913_v17, %v5430_v33  ;;  %v5432_v53 = vld [vmem:[#allocation73_spill] sm:$0xff]  ;;  %v5434_v56 = vld [vmem:[#allocation67_spill] sm:$0xff] }
 0x1e6   :  { %5425 = vst [vmem:[#allocation50_spill] sm:$0xff] %v4214_v32  ;;  %5427 = vst [vmem:[#allocation55_spill] sm:$0xff] %v4218_v51  ;;  %v4230_v37 = vmul.f32 %v3913_v17, %v5432_v53  ;;  %v4234_v12 = vmul.f32 %v5434_v56, %v3913_v17  ;;  %v5436_v32 = vld [vmem:[#allocation71_spill] sm:$0xff]  ;;  %v5438_v51 = vld [vmem:[#allocation77_spill] sm:$0xff] }
 0x1e7   :  { %5431 = vst [vmem:[#allocation65_spill] sm:$0xff] %v4226_v23  ;;  %v4238_v55 = vmul.f32 %v5436_v32, %v3913_v17  ;;  %v4242_v45 = vmul.f32 %v3913_v17, %v5438_v51  ;;  %v5440_v24 = vld [vmem:[#allocation81_spill] sm:$0xff]  ;;  %v5442_v23 = vld [vmem:[#allocation75_spill] sm:$0xff] }
 0x1e8   :  { %5433 = vst [vmem:[#allocation59_spill] sm:$0xff] %v4230_v37  ;;  %5435 = vst [vmem:[#allocation63_spill] sm:$0xff] %v4234_v12  ;;  %v4246_v33 = vmul.f32 %v3913_v17, %v5440_v24  ;;  %v4250_v53 = vmul.f32 %v5442_v23, %v3913_v17  ;;  %v5444_v37 = vld [vmem:[#allocation79_spill] sm:$0xff]  ;;  %v5446_v12 = vld [vmem:[#allocation85_spill] sm:$0xff] }
 0x1e9   :  { %5437 = vst [vmem:[#allocation69_spill] sm:$0xff] %v4238_v55  ;;  %5439 = vst [vmem:[#allocation73_spill] sm:$0xff] %v4242_v45  ;;  %v4254_v56 = vmul.f32 %v5444_v37, %v3913_v17  ;;  %v4258_v32 = vmul.f32 %v3913_v17, %v5446_v12  ;;  %v5448_v55 = vld [vmem:[#allocation89_spill] sm:$0xff]  ;;  %v5450_v45 = vld [vmem:[#allocation83_spill] sm:$0xff] }
 0x1ea   :  { %5441 = vst [vmem:[#allocation67_spill] sm:$0xff] %v4246_v33  ;;  %5443 = vst [vmem:[#allocation71_spill] sm:$0xff] %v4250_v53  ;;  %v4262_v51 = vmul.f32 %v3913_v17, %v5448_v55  ;;  %v4266_v24 = vmul.f32 %v5450_v45, %v3913_v17  ;;  %v5452_v33 = vld [vmem:[#allocation87_spill] sm:$0xff]  ;;  %v5454_v53 = vld [vmem:[#allocation93_spill] sm:$0xff] }
 0x1eb   :  { %5445 = vst [vmem:[#allocation77_spill] sm:$0xff] %v4254_v56  ;;  %5447 = vst [vmem:[#allocation81_spill] sm:$0xff] %v4258_v32  ;;  %v4270_v23 = vmul.f32 %v5452_v33, %v3913_v17  ;;  %v4274_v37 = vmul.f32 %v3913_v17, %v5454_v53  ;;  %v5456_v56 = vld [vmem:[#allocation97_spill] sm:$0xff]  ;;  %v5458_v32 = vld [vmem:[#allocation91_spill] sm:$0xff] }
 0x1ec   :  { %5449 = vst [vmem:[#allocation75_spill] sm:$0xff] %v4262_v51  ;;  %5451 = vst [vmem:[#allocation79_spill] sm:$0xff] %v4266_v24  ;;  %v4278_v12 = vmul.f32 %v3913_v17, %v5456_v56  ;;  %v4282_v55 = vmul.f32 %v5458_v32, %v3913_v17  ;;  %v5460_v51 = vld [vmem:[#allocation95_spill] sm:$0xff]  ;;  %v5462_v24 = vld [vmem:[#allocation101_spill] sm:$0xff] }
 0x1ed   :  { %5453 = vst [vmem:[#allocation85_spill] sm:$0xff] %v4270_v23  ;;  %5455 = vst [vmem:[#allocation89_spill] sm:$0xff] %v4274_v37  ;;  %v4286_v45 = vmul.f32 %v5460_v51, %v3913_v17  ;;  %v4290_v33 = vmul.f32 %v3913_v17, %v5462_v24  ;;  %v5464_v23 = vld [vmem:[#allocation104_spill] sm:$0xff]  ;;  %v5466_v37 = vld [vmem:[#allocation99_spill] sm:$0xff] }
 0x1ee   :  { %5457 = vst [vmem:[#allocation83_spill] sm:$0xff] %v4278_v12  ;;  %5459 = vst [vmem:[#allocation87_spill] sm:$0xff] %v4282_v55  ;;  %v4294_v53 = vmul.f32 %v3913_v17, %v5464_v23  ;;  %v4298_v56 = vmul.f32 %v5466_v37, %v3913_v17  ;;  %v5468_v12 = vld [vmem:[#allocation103_spill] sm:$0xff]  ;;  %v5470_v55 = vld [vmem:[#allocation49_spill] sm:$0xff] }
 0x1ef   :  { %5461 = vst [vmem:[#allocation93_spill] sm:$0xff] %v4286_v45  ;;  %5463 = vst [vmem:[#allocation97_spill] sm:$0xff] %v4290_v33  ;;  %v4302_v32 = vmul.f32 %v5468_v12, %v3913_v17  ;;  %v4306_v51 = vmul.f32 %v3913_v17, %v5470_v55  ;;  %v5472_v45 = vld [vmem:[#allocation53_spill] sm:$0xff]  ;;  %v5474_v33 = vld [vmem:[#allocation47_spill] sm:$0xff] }
 0x1f0   :  { %5465 = vst [vmem:[#allocation91_spill] sm:$0xff] %v4294_v53  ;;  %5467 = vst [vmem:[#allocation95_spill] sm:$0xff] %v4298_v56  ;;  %v4310_v24 = vmul.f32 %v3913_v17, %v5472_v45  ;;  %v4314_v23 = vmul.f32 %v5474_v33, %v3913_v17  ;;  %v5476_v53 = vld [vmem:[#allocation51_spill] sm:$0xff]  ;;  %v5478_v56 = vld [vmem:[#allocation56_spill] sm:$0xff] }
 0x1f1   :  { %5469 = vst [vmem:[#allocation101_spill] sm:$0xff] %v4302_v32  ;;  %5471 = vst [vmem:[#allocation104_spill] sm:$0xff] %v4306_v51  ;;  %v4318_v37 = vmul.f32 %v5476_v53, %v3913_v17  ;;  %v4322_v12 = vmul.f32 %v3913_v17, %v5478_v56  ;;  %v5480_v32 = vld [vmem:[#allocation58_spill] sm:$0xff] }
 0x1f2   :  { %5473 = vst [vmem:[#allocation99_spill] sm:$0xff] %v4310_v24  ;;  %5475 = vst [vmem:[#allocation103_spill] sm:$0xff] %v4314_v23  ;;  %v4326_v55 = vmul.f32 %v3913_v17, %v5480_v32  ;;  %v5482_v51 = vld [vmem:[#allocation54_spill] sm:$0xff]  ;;  %v5484_v24 = vld [vmem:[#allocation57_spill] sm:$0xff] }
 0x1f3   :  { %5477 = vst [vmem:[#allocation49_spill] sm:$0xff] %v4318_v37  ;;  %5479 = vst [vmem:[#allocation53_spill] sm:$0xff] %v4322_v12  ;;  %v4330_v45 = vmul.f32 %v5482_v51, %v3913_v17  ;;  %v4334_v33 = vmul.f32 %v5484_v24, %v3913_v17  ;;  %v5486_v23 = vld [vmem:[#allocation62_spill] sm:$0xff]  ;;  %v5490_v12 = vld [vmem:[#allocation60_spill] sm:$0xff] }
 0x1f4   :  { %5481 = vst [vmem:[#allocation47_spill] sm:$0xff] %v4326_v55  ;;  %v4338_v53 = vmul.f32 %v3913_v17, %v5486_v23  ;;  %v5488_v37 = vld [vmem:[#allocation66_spill] sm:$0xff]  ;;  %v4346_v32 = vmul.f32 %v5490_v12, %v3913_v17  ;;  %v5492_v55 = vld [vmem:[#allocation64_spill] sm:$0xff] }
 0x1f5   :  { %5483 = vst [vmem:[#allocation51_spill] sm:$0xff] %v4330_v45  ;;  %5485 = vst [vmem:[#allocation56_spill] sm:$0xff] %v4334_v33  ;;  %v4342_v56 = vmul.f32 %v3913_v17, %v5488_v37  ;;  %v4350_v51 = vmul.f32 %v5492_v55, %v3913_v17  ;;  %v5494_v45 = vld [vmem:[#allocation70_spill] sm:$0xff] }
 0x1f6   :  { %5487 = vst [vmem:[#allocation58_spill] sm:$0xff] %v4338_v53  ;;  %5491 = vst [vmem:[#allocation57_spill] sm:$0xff] %v4346_v32  ;;  %v4354_v24 = vmul.f32 %v3913_v17, %v5494_v45  ;;  %v5496_v33 = vld [vmem:[#allocation74_spill] sm:$0xff]  ;;  %v5498_v53 = vld [vmem:[#allocation68_spill] sm:$0xff] }
 0x1f7   :  { %5489 = vst [vmem:[#allocation54_spill] sm:$0xff] %v4342_v56  ;;  %5493 = vst [vmem:[#allocation62_spill] sm:$0xff] %v4350_v51  ;;  %v4358_v23 = vmul.f32 %v3913_v17, %v5496_v33  ;;  %v4362_v37 = vmul.f32 %v5498_v53, %v3913_v17  ;;  %v5500_v56 = vld [vmem:[#allocation72_spill] sm:$0xff]  ;;  %v5502_v32 = vld [vmem:[#allocation78_spill] sm:$0xff] }
 0x1f8   :  { %5495 = vst [vmem:[#allocation66_spill] sm:$0xff] %v4354_v24  ;;  %v4366_v12 = vmul.f32 %v5500_v56, %v3913_v17  ;;  %v4370_v55 = vmul.f32 %v3913_v17, %v5502_v32  ;;  %v5504_v51 = vld [vmem:[#allocation82_spill] sm:$0xff]  ;;  %v5506_v24 = vld [vmem:[#allocation76_spill] sm:$0xff] }
 0x1f9   :  { %5497 = vst [vmem:[#allocation60_spill] sm:$0xff] %v4358_v23  ;;  %5499 = vst [vmem:[#allocation64_spill] sm:$0xff] %v4362_v37  ;;  %v4374_v45 = vmul.f32 %v3913_v17, %v5504_v51  ;;  %v4378_v33 = vmul.f32 %v5506_v24, %v3913_v17  ;;  %v5508_v23 = vld [vmem:[#allocation80_spill] sm:$0xff]  ;;  %v5510_v37 = vld [vmem:[#allocation86_spill] sm:$0xff] }
 0x1fa   :  { %5501 = vst [vmem:[#allocation70_spill] sm:$0xff] %v4366_v12  ;;  %5503 = vst [vmem:[#allocation74_spill] sm:$0xff] %v4370_v55  ;;  %v4382_v53 = vmul.f32 %v5508_v23, %v3913_v17  ;;  %v4386_v56 = vmul.f32 %v3913_v17, %v5510_v37  ;;  %v5512_v12 = vld [vmem:[#allocation90_spill] sm:$0xff]  ;;  %v5514_v55 = vld [vmem:[#allocation84_spill] sm:$0xff] }
 0x1fb   :  { %5505 = vst [vmem:[#allocation68_spill] sm:$0xff] %v4374_v45  ;;  %5507 = vst [vmem:[#allocation72_spill] sm:$0xff] %v4378_v33  ;;  %v4390_v32 = vmul.f32 %v3913_v17, %v5512_v12  ;;  %v4394_v51 = vmul.f32 %v5514_v55, %v3913_v17  ;;  %v5516_v45 = vld [vmem:[#allocation88_spill] sm:$0xff]  ;;  %v5518_v33 = vld [vmem:[#allocation94_spill] sm:$0xff] }
 0x1fc   :  { %5509 = vst [vmem:[#allocation78_spill] sm:$0xff] %v4382_v53  ;;  %5511 = vst [vmem:[#allocation82_spill] sm:$0xff] %v4386_v56  ;;  %v4398_v24 = vmul.f32 %v5516_v45, %v3913_v17  ;;  %v4402_v23 = vmul.f32 %v3913_v17, %v5518_v33  ;;  %v5520_v53 = vld [vmem:[#allocation98_spill] sm:$0xff]  ;;  %v5522_v56 = vld [vmem:[#allocation92_spill] sm:$0xff] }
 0x1fd   :  { %5513 = vst [vmem:[#allocation76_spill] sm:$0xff] %v4390_v32  ;;  %5515 = vst [vmem:[#allocation80_spill] sm:$0xff] %v4394_v51  ;;  %v4406_v37 = vmul.f32 %v3913_v17, %v5520_v53  ;;  %v4410_v12 = vmul.f32 %v5522_v56, %v3913_v17  ;;  %v5524_v32 = vld [vmem:[#allocation96_spill] sm:$0xff]  ;;  %v5526_v51 = vld [vmem:[#allocation102_spill] sm:$0xff]  ;;  %v4426_v53 = vmul.f32 %v3872_v28, %v3913_v17 }
 0x1fe   :  { %5517 = vst [vmem:[#allocation86_spill] sm:$0xff] %v4398_v24  ;;  %5519 = vst [vmem:[#allocation90_spill] sm:$0xff] %v4402_v23  ;;  %v4414_v55 = vmul.f32 %v5524_v32, %v3913_v17  ;;  %v4418_v45 = vmul.f32 %v3913_v17, %v5526_v51  ;;  %v5528_v24 = vld [vmem:[#allocation100_spill] sm:$0xff]  ;;  %v1915_v56 = vadd.f32 %v3969_v5, %v3919_v41 }
 0x1ff   :  { %5521 = vst [vmem:[#allocation84_spill] sm:$0xff] %v4406_v37  ;;  %5523 = vst [vmem:[#allocation88_spill] sm:$0xff] %v4410_v12  ;;  %v4422_v33 = vmul.f32 %v5528_v24, %v3913_v17  ;;  %v1916_v12 = vadd.f32 %v3969_v5, %v3923_v7  ;;  %v1917_v32 = vadd.f32 %v3969_v5, %v3927_v61 }
 0x200   :  { %5525 = vst [vmem:[#allocation94_spill] sm:$0xff] %v4414_v55  ;;  %5527 = vst [vmem:[#allocation98_spill] sm:$0xff] %v4418_v45  ;;  %v1918_v51 = vadd.f32 %v3969_v5, %v3931_v25  ;;  %v4438_v24 = vadd.f32 %v3969_v5, %v3935_v1  ;;  %v4442_v28 = vadd.f32 %v3969_v5, %v3939_v10 }
 0x201   :  { %5529 = vst [vmem:[#allocation92_spill] sm:$0xff] %v4422_v33  ;;  %5530 = vst [vmem:[#allocation96_spill] sm:$0xff] %v4426_v53  ;;  %v4446_v17 = vadd.f32 %v3969_v5, %v3943_v16  ;;  %v4450_v41 = vadd.f32 %v3969_v5, %v3947_v8  ;;  %v4454_v7 = vadd.f32 %v3969_v5, %v3951_v13 }
 0x202   :  { %v4458_v61 = vadd.f32 %v3969_v5, %v3955_v36  ;;  %v4462_v25 = vadd.f32 %v3969_v5, %v3959_v46  ;;  %v4466_v1 = vadd.f32 %v3969_v5, %v3963_v31  ;;  %v4470_v10 = vadd.f32 %v3969_v5, %v3967_v42 }
 0x203   :  { %v4474_v16 = vadd.f32 %v3969_v5, %v3973_v4  ;;  %v4478_v8 = vadd.f32 %v3969_v5, %v3977_v22  ;;  %v4482_v13 = vadd.f32 %v3969_v5, %v3981_v62  ;;  %v4486_v36 = vadd.f32 %v3969_v5, %v3985_v18 }
 0x204   :  { %v4490_v46 = vadd.f32 %v3969_v5, %v3989_v52  ;;  %v4494_v31 = vadd.f32 %v3969_v5, %v3993_v0  ;;  %v4498_v42 = vadd.f32 %v3969_v5, %v3997_v44  ;;  %v4502_v4 = vadd.f32 %v3969_v5, %v4002_v58 }
 0x205   :  { %v4506_v22 = vadd.f32 %v3969_v5, %v4006_v40  ;;  %v4510_v62 = vadd.f32 %v3969_v5, %v4010_v60  ;;  %v4514_v18 = vadd.f32 %v3969_v5, %v4014_v30  ;;  %v4518_v52 = vadd.f32 %v3969_v5, %v4018_v54 }
 0x206   :  { %v4522_v0 = vadd.f32 %v3969_v5, %v4022_v50  ;;  %v4526_v44 = vadd.f32 %v3969_v5, %v4026_v20  ;;  %v4530_v58 = vadd.f32 %v3969_v5, %v4030_v34  ;;  %v4534_v40 = vadd.f32 %v3969_v5, %v4034_v6 }
 0x207   :  { %v4538_v60 = vadd.f32 %v3969_v5, %v4038_v26  ;;  %v4542_v30 = vadd.f32 %v3969_v5, %v4042_v38  ;;  %v1947_v54 = vmul.f32 0.2, %v1915_v56  ;;  %v1948_v50 = vmul.f32 0.2, %v1916_v12 }
 0x208   :  { %v4546_v20 = vadd.f32 %v3969_v5, %v4046_v15  ;;  %v1949_v34 = vmul.f32 0.2, %v1917_v32  ;;  %v1950_v53 = vmul.f32 0.2, %v1918_v51  ;;  %v1951_v33 = vmul.f32 0.2, %v4438_v24 }
 0x209   :  { %v1952_v6 = vmul.f32 0.2, %v4442_v28  ;;  %v1953_v45 = vmul.f32 0.2, %v4446_v17  ;;  %v1954_v26 = vmul.f32 0.2, %v4450_v41  ;;  %v1979_v55 = vmax.f32 %v1915_v56, %v1947_v54 }
 0x20a   :  { %v1955_v38 = vmul.f32 0.2, %v4454_v7  ;;  %v1956_v37 = vmul.f32 0.2, %v4458_v61  ;;  %v1957_v23 = vmul.f32 0.2, %v4462_v25  ;;  %v1980_v21 = vmax.f32 %v1916_v12, %v1948_v50 }
 0x20b   :  { %v1958_v15 = vmul.f32 0.2, %v4466_v1  ;;  %v1959_v11 = vmul.f32 0.2, %v4470_v10  ;;  %v1960_v9 = vmul.f32 0.2, %v4474_v16  ;;  %v1981_v48 = vmax.f32 %v1917_v32, %v1949_v34 }
 0x20c   :  { %2011 = vst [vmem:[#allocation8] sm:$0xff] %v1979_v55  ;;  %v1961_v29 = vmul.f32 0.2, %v4478_v8  ;;  %v1962_v49 = vmul.f32 0.2, %v4482_v13  ;;  %v1982_v54 = vmax.f32 %v1918_v51, %v1950_v53  ;;  %2012 = vst [vmem:[#allocation8 + $0x8] sm:$0xff] %v1980_v21  ;;  %v1983_v19 = vmax.f32 %v4438_v24, %v1951_v33 }
 0x20d   :  { %v1963_v56 = vmul.f32 0.2, %v4486_v36  ;;  %v1964_v57 = vmul.f32 0.2, %v4490_v46  ;;  %v1965_v12 = vmul.f32 0.2, %v4494_v31  ;;  %v1984_v63 = vmax.f32 %v4442_v28, %v1952_v6 }
 0x20e   :  { %v1966_v50 = vmul.f32 0.2, %v4498_v42  ;;  %2013 = vst [vmem:[#allocation8 + $0x10] sm:$0xff] %v1981_v48  ;;  %v1967_v32 = vmul.f32 0.2, %v4502_v4  ;;  %2014 = vst [vmem:[#allocation8 + $0x18] sm:$0xff] %v1982_v54  ;;  %v1985_v43 = vmax.f32 %v4446_v17, %v1953_v45  ;;  %v1986_v27 = vmax.f32 %v4450_v41, %v1954_v26 }
 0x20f   :  { %v1968_v55 = vmul.f32 0.2, %v4506_v22  ;;  %v1969_v34 = vmul.f32 0.2, %v4510_v62  ;;  %v1970_v21 = vmul.f32 0.2, %v4514_v18  ;;  %v1987_v39 = vmax.f32 %v4454_v7, %v1955_v38 }
 0x210   :  { %v1971_v53 = vmul.f32 0.2, %v4518_v52  ;;  %v1972_v51 = vmul.f32 0.2, %v4522_v0  ;;  %2015 = vst [vmem:[#allocation8 + $0x20] sm:$0xff] %v1983_v19  ;;  %2016 = vst [vmem:[#allocation8 + $0x28] sm:$0xff] %v1984_v63  ;;  %v1988_v19 = vmax.f32 %v4458_v61, %v1956_v37  ;;  %v1989_v45 = vmax.f32 %v4462_v25, %v1957_v23 }
 0x211   :  { %v1973_v48 = vmul.f32 0.2, %v4526_v44  ;;  %v1974_v33 = vmul.f32 0.2, %v4530_v58  ;;  %v1975_v24 = vmul.f32 0.2, %v4534_v40  ;;  %v1990_v17 = vmax.f32 %v4466_v1, %v1958_v15 }
 0x212   :  { %v1976_v28 = vmul.f32 0.2, %v4538_v60  ;;  %v1977_v6 = vmul.f32 0.2, %v4542_v30  ;;  %v1978_v54 = vmul.f32 0.2, %v4546_v20  ;;  %v1991_v14 = vmax.f32 %v4470_v10, %v1959_v11 }
 0x213   :  { %2017 = vst [vmem:[#allocation8 + $0x30] sm:$0xff] %v1985_v43  ;;  %2018 = vst [vmem:[#allocation8 + $0x38] sm:$0xff] %v1986_v27  ;;  %v1992_v63 = vmax.f32 %v4474_v16, %v1960_v9  ;;  %v1993_v41 = vmax.f32 %v4478_v8, %v1961_v29  ;;  %v1994_v26 = vmax.f32 %v4482_v13, %v1962_v49  ;;  %v5531_v13 = vld [vmem:[#allocation40_spill] sm:$0xff]  ;;  %v5542_v15 = vld [vmem:[#allocation23_spill] sm:$0xff] }
 0x214   :  { %v1995_v47 = vmax.f32 %v4486_v36, %v1963_v56  ;;  %2019 = vst [vmem:[#allocation8 + $0x40] sm:$0xff] %v1987_v39  ;;  %v1996_v43 = vmax.f32 %v4490_v46, %v1964_v57  ;;  %v1997_v37 = vmax.f32 %v4494_v31, %v1965_v12  ;;  %v1998_v23 = vmax.f32 %v4498_v42, %v1966_v50  ;;  %v5543_v12 = vld [vmem:[#allocation20_spill] sm:$0xff] }
 0x215   :  { %v1999_v7 = vmax.f32 %v4502_v4, %v1967_v32  ;;  %2020 = vst [vmem:[#allocation8 + $0x48] sm:$0xff] %v1988_v19  ;;  %2021 = vst [vmem:[#allocation8 + $0x50] sm:$0xff] %v1989_v45  ;;  %v2000_v27 = vmax.f32 %v4506_v22, %v1968_v55  ;;  %v2001_v29 = vmax.f32 %v4510_v62, %v1969_v34  ;;  %v5536_v22 = vld [vmem:[#allocation14_spill] sm:$0xff]  ;;  %v5545_v34 = vld [vmem:[#allocation25_spill] sm:$0xff] }
 0x216   :  { %2022 = vst [vmem:[#allocation8 + $0x58] sm:$0xff] %v1990_v17  ;;  %2023 = vst [vmem:[#allocation8 + $0x60] sm:$0xff] %v1991_v14  ;;  %v2002_v49 = vmax.f32 %v4514_v18, %v1970_v21  ;;  %v2003_v39 = vmax.f32 %v4518_v52, %v1971_v53  ;;  %v2004_v57 = vmax.f32 %v4522_v0, %v1972_v51  ;;  %v5537_v18 = vld [vmem:[#allocation17_spill] sm:$0xff]  ;;  %v5538_v0 = vld [vmem:[#allocation19_spill] sm:$0xff] }
 0x217   :  { %2024 = vst [vmem:[#allocation8 + $0x68] sm:$0xff] %v1992_v63  ;;  %2025 = vst [vmem:[#allocation8 + $0x70] sm:$0xff] %v1993_v41  ;;  %v2005_v9 = vmax.f32 %v4526_v44, %v1973_v48  ;;  %v2006_v11 = vmax.f32 %v4530_v58, %v1974_v33  ;;  %v2007_v14 = vmax.f32 %v4534_v40, %v1975_v24  ;;  %v5539_v58 = vld [vmem:[#allocation16_spill] sm:$0xff]  ;;  %v5544_v32 = vld [vmem:[#allocation22_spill] sm:$0xff] }
 0x218   :  { %2026 = vst [vmem:[#allocation8 + $0x78] sm:$0xff] %v1994_v26  ;;  %2027 = vst [vmem:[#allocation8 + $0x80] sm:$0xff] %v1995_v47  ;;  %v2008_v61 = vmax.f32 %v4538_v60, %v1976_v28  ;;  %v2009_v25 = vmax.f32 %v4542_v30, %v1977_v6  ;;  %v2010_v1 = vmax.f32 %v4546_v20, %v1978_v54  ;;  %v5540_v60 = vld [vmem:[#allocation18_spill] sm:$0xff]  ;;  %v5541_v20 = vld [vmem:[#allocation21_spill] sm:$0xff] }
 0x219   :  { %2028 = vst [vmem:[#allocation8 + $0x88] sm:$0xff] %v1996_v43  ;;  %2029 = vst [vmem:[#allocation8 + $0x90] sm:$0xff] %v1997_v37  ;;  %v2107_v47 = vadd.f32 %v4050_v35, %v3969_v5  ;;  %v2108_v10 = vadd.f32 %v4054_v2, %v3969_v5  ;;  %v2109_v16 = vadd.f32 %v4058_v3, %v3969_v5  ;;  %v5532_v35 = vld [vmem:[#allocation43_spill] sm:$0xff]  ;;  %v5533_v2 = vld [vmem:[#allocation13_spill] sm:$0xff] }
 0x21a   :  { %2030 = vst [vmem:[#allocation8 + $0x98] sm:$0xff] %v1998_v23  ;;  %2031 = vst [vmem:[#allocation8 + $0xa0] sm:$0xff] %v1999_v7  ;;  %v4612_v8 = vadd.f32 %v4062_v59, %v3969_v5  ;;  %v4616_v36 = vadd.f32 %v5531_v13, %v3969_v5  ;;  %v4620_v46 = vadd.f32 %v5532_v35, %v3969_v5  ;;  %v5534_v3 = vld [vmem:[#allocation15_spill] sm:$0xff]  ;;  %v5535_v59 = vld [vmem:[#allocation12_spill] sm:$0xff] }
 0x21b   :  { %2032 = vst [vmem:[#allocation8 + $0xa8] sm:$0xff] %v2000_v27  ;;  %2033 = vst [vmem:[#allocation8 + $0xb0] sm:$0xff] %v2001_v29  ;;  %v4624_v31 = vadd.f32 %v5533_v2, %v3969_v5  ;;  %v4628_v42 = vadd.f32 %v5534_v3, %v3969_v5  ;;  %v4632_v4 = vadd.f32 %v5535_v59, %v3969_v5  ;;  %v5546_v53 = vld [vmem:[#allocation27_spill] sm:$0xff]  ;;  %v5547_v48 = vld [vmem:[#allocation24_spill] sm:$0xff] }
 0x21c   :  { %2034 = vst [vmem:[#allocation8 + $0xb8] sm:$0xff] %v2002_v49  ;;  %2035 = vst [vmem:[#allocation8 + $0xc0] sm:$0xff] %v2003_v39  ;;  %v4636_v62 = vadd.f32 %v5536_v22, %v3969_v5  ;;  %v4640_v52 = vadd.f32 %v5537_v18, %v3969_v5  ;;  %v4644_v44 = vadd.f32 %v5538_v0, %v3969_v5  ;;  %v5548_v24 = vld [vmem:[#allocation26_spill] sm:$0xff]  ;;  %v5549_v6 = vld [vmem:[#allocation29_spill] sm:$0xff]  ;;  %v2142_v13 = vmul.f32 0.2, %v4612_v8 }
 0x21d   :  { %2036 = vst [vmem:[#allocation8 + $0xc8] sm:$0xff] %v2004_v57  ;;  %2037 = vst [vmem:[#allocation8 + $0xd0] sm:$0xff] %v2005_v9  ;;  %v4648_v40 = vadd.f32 %v5539_v58, %v3969_v5  ;;  %v4652_v30 = vadd.f32 %v5540_v60, %v3969_v5  ;;  %v4656_v38 = vadd.f32 %v5541_v20, %v3969_v5  ;;  %v5550_v19 = vld [vmem:[#allocation31_spill] sm:$0xff]  ;;  %v5551_v17 = vld [vmem:[#allocation28_spill] sm:$0xff]  ;;  %v2143_v35 = vmul.f32 0.2, %v4616_v36 }
 0x21e   :  { %2038 = vst [vmem:[#allocation8 + $0xd8] sm:$0xff] %v2006_v11  ;;  %2039 = vst [vmem:[#allocation8 + $0xe0] sm:$0xff] %v2007_v14  ;;  %v4660_v56 = vadd.f32 %v5542_v15, %v3969_v5  ;;  %v4664_v50 = vadd.f32 %v5543_v12, %v3969_v5  ;;  %v4668_v55 = vadd.f32 %v5544_v32, %v3969_v5  ;;  %v5552_v41 = vld [vmem:[#allocation30_spill] sm:$0xff]  ;;  %v5553_v43 = vld [vmem:[#allocation33_spill] sm:$0xff]  ;;  %v2139_v11 = vmul.f32 0.2, %v2107_v47 }
 0x21f   :  { %2040 = vst [vmem:[#allocation8 + $0xe8] sm:$0xff] %v2008_v61  ;;  %2041 = vst [vmem:[#allocation8 + $0xf0] sm:$0xff] %v2009_v25  ;;  %v4672_v21 = vadd.f32 %v5545_v34, %v3969_v5  ;;  %v4676_v51 = vadd.f32 %v5546_v53, %v3969_v5  ;;  %v4680_v33 = vadd.f32 %v5547_v48, %v3969_v5  ;;  %v5554_v23 = vld [vmem:[#allocation35_spill] sm:$0xff]  ;;  %v5555_v27 = vld [vmem:[#allocation32_spill] sm:$0xff]  ;;  %v2140_v14 = vmul.f32 0.2, %v2108_v10 }
 0x220   :  { %2042 = vst [vmem:[#allocation8 + $0xf8] sm:$0xff] %v2010_v1  ;;  %v4684_v28 = vadd.f32 %v5548_v24, %v3969_v5  ;;  %v4688_v54 = vadd.f32 %v5549_v6, %v3969_v5  ;;  %v4692_v45 = vadd.f32 %v5550_v19, %v3969_v5  ;;  %v4696_v63 = vadd.f32 %v5551_v17, %v3969_v5  ;;  %v5556_v49 = vld [vmem:[#allocation34_spill] sm:$0xff]  ;;  %v5557_v57 = vld [vmem:[#allocation37_spill] sm:$0xff]  ;;  %v5558_v61 = vld [vmem:[#allocation39_spill] sm:$0xff] }
 0x221   :  { %v4700_v26 = vadd.f32 %v5552_v41, %v3969_v5  ;;  %v4704_v37 = vadd.f32 %v5553_v43, %v3969_v5  ;;  %v4708_v7 = vadd.f32 %v5554_v23, %v3969_v5  ;;  %v4712_v29 = vadd.f32 %v5555_v27, %v3969_v5 }
 0x222   :  { %v4716_v39 = vadd.f32 %v5556_v49, %v3969_v5  ;;  %v4720_v9 = vadd.f32 %v5557_v57, %v3969_v5  ;;  %v4724_v25 = vadd.f32 %v5558_v61, %v3969_v5  ;;  %v2141_v1 = vmul.f32 0.2, %v2109_v16 }
 0x223   :  { %v2144_v2 = vmul.f32 0.2, %v4620_v46  ;;  %v2145_v3 = vmul.f32 0.2, %v4624_v31  ;;  %v2146_v59 = vmul.f32 0.2, %v4628_v42  ;;  %v2171_v22 = vmax.f32 %v2107_v47, %v2139_v11 }
 0x224   :  { %v2147_v18 = vmul.f32 0.2, %v4632_v4  ;;  %v2148_v0 = vmul.f32 0.2, %v4636_v62  ;;  %v2149_v58 = vmul.f32 0.2, %v4640_v52  ;;  %v2172_v60 = vmax.f32 %v2108_v10, %v2140_v14 }
 0x225   :  { %v2150_v20 = vmul.f32 0.2, %v4644_v44  ;;  %v2151_v15 = vmul.f32 0.2, %v4648_v40  ;;  %v2152_v12 = vmul.f32 0.2, %v4652_v30  ;;  %v2173_v32 = vmax.f32 %v2109_v16, %v2141_v1 }
 0x226   :  { %2204 = vst [vmem:[#allocation8 + $0x100] sm:$0xff] %v2171_v22  ;;  %v2153_v34 = vmul.f32 0.2, %v4656_v38  ;;  %v2154_v53 = vmul.f32 0.2, %v4660_v56  ;;  %v2174_v48 = vmax.f32 %v4612_v8, %v2142_v13  ;;  %2205 = vst [vmem:[#allocation8 + $0x108] sm:$0xff] %v2172_v60  ;;  %v2175_v19 = vmax.f32 %v4616_v36, %v2143_v35 }
 0x227   :  { %v2155_v47 = vmul.f32 0.2, %v4664_v50  ;;  %v2156_v24 = vmul.f32 0.2, %v4668_v55  ;;  %v2157_v10 = vmul.f32 0.2, %v4672_v21  ;;  %v2176_v43 = vmax.f32 %v4620_v46, %v2144_v2 }
 0x228   :  { %v2158_v6 = vmul.f32 0.2, %v4676_v51  ;;  %2206 = vst [vmem:[#allocation8 + $0x110] sm:$0xff] %v2173_v32  ;;  %v2159_v16 = vmul.f32 0.2, %v4680_v33  ;;  %2207 = vst [vmem:[#allocation8 + $0x118] sm:$0xff] %v2174_v48  ;;  %v2177_v49 = vmax.f32 %v4624_v31, %v2145_v3  ;;  %v2178_v14 = vmax.f32 %v4628_v42, %v2146_v59 }
 0x229   :  { %v2160_v17 = vmul.f32 0.2, %v4684_v28  ;;  %v2161_v41 = vmul.f32 0.2, %v4688_v54  ;;  %v2162_v8 = vmul.f32 0.2, %v4692_v45  ;;  %v2179_v13 = vmax.f32 %v4632_v4, %v2147_v18 }
 0x22a   :  { %v2163_v23 = vmul.f32 0.2, %v4696_v63  ;;  %v2164_v27 = vmul.f32 0.2, %v4700_v26  ;;  %2208 = vst [vmem:[#allocation8 + $0x120] sm:$0xff] %v2175_v19  ;;  %2209 = vst [vmem:[#allocation8 + $0x128] sm:$0xff] %v2176_v43  ;;  %v2180_v31 = vmax.f32 %v4636_v62, %v2148_v0  ;;  %v2181_v35 = vmax.f32 %v4640_v52, %v2149_v58 }
 0x22b   :  { %v2165_v36 = vmul.f32 0.2, %v4704_v37  ;;  %v2166_v57 = vmul.f32 0.2, %v4708_v7  ;;  %v2167_v11 = vmul.f32 0.2, %v4712_v29  ;;  %v2182_v2 = vmax.f32 %v4644_v44, %v2150_v20 }
 0x22c   :  { %v2168_v46 = vmul.f32 0.2, %v4716_v39  ;;  %v2169_v61 = vmul.f32 0.2, %v4720_v9  ;;  %v2170_v1 = vmul.f32 0.2, %v4724_v25  ;;  %v2183_v3 = vmax.f32 %v4648_v40, %v2151_v15 }
 0x22d   :  { %2210 = vst [vmem:[#allocation8 + $0x130] sm:$0xff] %v2177_v49  ;;  %2211 = vst [vmem:[#allocation8 + $0x138] sm:$0xff] %v2178_v14  ;;  %v2184_v42 = vmax.f32 %v4652_v30, %v2152_v12  ;;  %v2185_v59 = vmax.f32 %v4656_v38, %v2153_v34  ;;  %v2186_v22 = vmax.f32 %v4660_v56, %v2154_v53  ;;  %v5564_v0 = vld [vmem:[#allocation44_spill] sm:$0xff]  ;;  %v5567_v34 = vld [vmem:[#allocation46_spill] sm:$0xff] }
 0x22e   :  { %v2187_v60 = vmax.f32 %v4664_v50, %v2155_v47  ;;  %2212 = vst [vmem:[#allocation8 + $0x140] sm:$0xff] %v2179_v13  ;;  %v2188_v4 = vmax.f32 %v4668_v55, %v2156_v24  ;;  %v2189_v62 = vmax.f32 %v4672_v21, %v2157_v10  ;;  %v2190_v52 = vmax.f32 %v4676_v51, %v2158_v6  ;;  %v5565_v20 = vld [vmem:[#allocation48_spill] sm:$0xff]  ;;  %v5568_v47 = vld [vmem:[#allocation50_spill] sm:$0xff]  ;;  %v5569_v24 = vld [vmem:[#allocation55_spill] sm:$0xff] }
 0x22f   :  { %v2191_v44 = vmax.f32 %v4680_v33, %v2159_v16  ;;  %2213 = vst [vmem:[#allocation8 + $0x148] sm:$0xff] %v2180_v31  ;;  %2214 = vst [vmem:[#allocation8 + $0x150] sm:$0xff] %v2181_v35  ;;  %v2192_v40 = vmax.f32 %v4684_v28, %v2160_v17  ;;  %v2193_v30 = vmax.f32 %v4688_v54, %v2161_v41  ;;  %v5566_v12 = vld [vmem:[#allocation52_spill] sm:$0xff]  ;;  %v5570_v6 = vld [vmem:[#allocation61_spill] sm:$0xff] }
 0x230   :  { %2215 = vst [vmem:[#allocation8 + $0x158] sm:$0xff] %v2182_v2  ;;  %2216 = vst [vmem:[#allocation8 + $0x160] sm:$0xff] %v2183_v3  ;;  %v2194_v38 = vmax.f32 %v4692_v45, %v2162_v8  ;;  %v2195_v56 = vmax.f32 %v4696_v63, %v2163_v23  ;;  %v2196_v50 = vmax.f32 %v4700_v26, %v2164_v27  ;;  %v5559_v45 = vld [vmem:[#allocation36_spill] sm:$0xff]  ;;  %v5560_v26 = vld [vmem:[#allocation38_spill] sm:$0xff] }
 0x231   :  { %2217 = vst [vmem:[#allocation8 + $0x168] sm:$0xff] %v2184_v42  ;;  %2218 = vst [vmem:[#allocation8 + $0x170] sm:$0xff] %v2185_v59  ;;  %v2197_v55 = vmax.f32 %v4704_v37, %v2165_v36  ;;  %v2198_v21 = vmax.f32 %v4708_v7, %v2166_v57  ;;  %v2199_v51 = vmax.f32 %v4712_v29, %v2167_v11  ;;  %v5561_v7 = vld [vmem:[#allocation42_spill] sm:$0xff]  ;;  %v5571_v16 = vld [vmem:[#allocation65_spill] sm:$0xff] }
 0x232   :  { %2219 = vst [vmem:[#allocation8 + $0x178] sm:$0xff] %v2186_v22  ;;  %2220 = vst [vmem:[#allocation8 + $0x180] sm:$0xff] %v2187_v60  ;;  %v2200_v33 = vmax.f32 %v4716_v39, %v2168_v46  ;;  %v2201_v28 = vmax.f32 %v4720_v9, %v2169_v61  ;;  %v2202_v54 = vmax.f32 %v4724_v25, %v2170_v1  ;;  %v5562_v39 = vld [vmem:[#allocation45_spill] sm:$0xff]  ;;  %v5572_v41 = vld [vmem:[#allocation59_spill] sm:$0xff] }
 0x233   :  { %2221 = vst [vmem:[#allocation8 + $0x188] sm:$0xff] %v2188_v4  ;;  %2222 = vst [vmem:[#allocation8 + $0x190] sm:$0xff] %v2189_v62  ;;  %v2300_v63 = vadd.f32 %v5559_v45, %v3969_v5  ;;  %v2301_v37 = vadd.f32 %v5560_v26, %v3969_v5  ;;  %v2302_v29 = vadd.f32 %v5561_v7, %v3969_v5  ;;  %v5563_v25 = vld [vmem:[#allocation41_spill] sm:$0xff]  ;;  %v5573_v8 = vld [vmem:[#allocation63_spill] sm:$0xff] }
 0x234   :  { %2223 = vst [vmem:[#allocation8 + $0x198] sm:$0xff] %v2190_v52  ;;  %2224 = vst [vmem:[#allocation8 + $0x1a0] sm:$0xff] %v2191_v44  ;;  %v4792_v9 = vadd.f32 %v5562_v39, %v3969_v5  ;;  %v4796_v18 = vadd.f32 %v5563_v25, %v3969_v5  ;;  %v4800_v58 = vadd.f32 %v5564_v0, %v3969_v5  ;;  %v5574_v27 = vld [vmem:[#allocation69_spill] sm:$0xff]  ;;  %v5576_v11 = vld [vmem:[#allocation67_spill] sm:$0xff] }
 0x235   :  { %2225 = vst [vmem:[#allocation8 + $0x1a8] sm:$0xff] %v2192_v40  ;;  %2226 = vst [vmem:[#allocation8 + $0x1b0] sm:$0xff] %v2193_v30  ;;  %v4804_v15 = vadd.f32 %v5565_v20, %v3969_v5  ;;  %v4808_v32 = vadd.f32 %v5566_v12, %v3969_v5  ;;  %v4812_v53 = vadd.f32 %v5567_v34, %v3969_v5  ;;  %v5575_v36 = vld [vmem:[#allocation73_spill] sm:$0xff]  ;;  %v5577_v46 = vld [vmem:[#allocation71_spill] sm:$0xff]  ;;  %v2333_v45 = vmul.f32 0.2, %v2301_v37 }
 0x236   :  { %2227 = vst [vmem:[#allocation8 + $0x1b8] sm:$0xff] %v2194_v38  ;;  %2228 = vst [vmem:[#allocation8 + $0x1c0] sm:$0xff] %v2195_v56  ;;  %v4816_v48 = vadd.f32 %v5568_v47, %v3969_v5  ;;  %v4820_v10 = vadd.f32 %v5569_v24, %v3969_v5  ;;  %v4824_v19 = vadd.f32 %v5570_v6, %v3969_v5  ;;  %v5578_v1 = vld [vmem:[#allocation77_spill] sm:$0xff]  ;;  %v5580_v2 = vld [vmem:[#allocation75_spill] sm:$0xff]  ;;  %v2334_v39 = vmul.f32 0.2, %v2302_v29 }
 0x237   :  { %2229 = vst [vmem:[#allocation8 + $0x1c8] sm:$0xff] %v2196_v50  ;;  %2230 = vst [vmem:[#allocation8 + $0x1d0] sm:$0xff] %v2197_v55  ;;  %v4828_v17 = vadd.f32 %v5571_v16, %v3969_v5  ;;  %v4832_v43 = vadd.f32 %v5572_v41, %v3969_v5  ;;  %v4836_v23 = vadd.f32 %v5573_v8, %v3969_v5  ;;  %v5579_v31 = vld [vmem:[#allocation81_spill] sm:$0xff]  ;;  %v5581_v42 = vld [vmem:[#allocation79_spill] sm:$0xff]  ;;  %v2335_v25 = vmul.f32 0.2, %v4792_v9 }
 0x238   :  { %2231 = vst [vmem:[#allocation8 + $0x1d8] sm:$0xff] %v2198_v21  ;;  %2232 = vst [vmem:[#allocation8 + $0x1e0] sm:$0xff] %v2199_v51  ;;  %v4840_v49 = vadd.f32 %v5574_v27, %v3969_v5  ;;  %v4844_v57 = vadd.f32 %v5575_v36, %v3969_v5  ;;  %v4848_v14 = vadd.f32 %v5576_v11, %v3969_v5  ;;  %v5582_v22 = vld [vmem:[#allocation85_spill] sm:$0xff]  ;;  %v5584_v52 = vld [vmem:[#allocation83_spill] sm:$0xff]  ;;  %v2336_v0 = vmul.f32 0.2, %v4796_v18 }
 0x239   :  { %2233 = vst [vmem:[#allocation8 + $0x1e8] sm:$0xff] %v2200_v33  ;;  %2234 = vst [vmem:[#allocation8 + $0x1f0] sm:$0xff] %v2201_v28  ;;  %v4852_v61 = vadd.f32 %v5577_v46, %v3969_v5  ;;  %v4856_v13 = vadd.f32 %v5578_v1, %v3969_v5  ;;  %v4860_v35 = vadd.f32 %v5579_v31, %v3969_v5  ;;  %v5583_v4 = vld [vmem:[#allocation89_spill] sm:$0xff]  ;;  %v5585_v40 = vld [vmem:[#allocation87_spill] sm:$0xff]  ;;  %v2337_v20 = vmul.f32 0.2, %v4800_v58 }
 0x23a   :  { %2235 = vst [vmem:[#allocation8 + $0x1f8] sm:$0xff] %v2202_v54  ;;  %v4864_v3 = vadd.f32 %v5580_v2, %v3969_v5  ;;  %v4868_v59 = vadd.f32 %v5581_v42, %v3969_v5  ;;  %v4872_v60 = vadd.f32 %v5582_v22, %v3969_v5  ;;  %v4876_v62 = vadd.f32 %v5583_v4, %v3969_v5  ;;  %v5586_v38 = vld [vmem:[#allocation93_spill] sm:$0xff]  ;;  %v5588_v21 = vld [vmem:[#allocation91_spill] sm:$0xff] }
 0x23b   :  { %v4880_v44 = vadd.f32 %v5584_v52, %v3969_v5  ;;  %v4884_v30 = vadd.f32 %v5585_v40, %v3969_v5  ;;  %v4888_v56 = vadd.f32 %v5586_v38, %v3969_v5  ;;  %v5587_v50 = vld [vmem:[#allocation97_spill] sm:$0xff]  ;;  %v4896_v51 = vadd.f32 %v5588_v21, %v3969_v5  ;;  %v5589_v33 = vld [vmem:[#allocation95_spill] sm:$0xff] }
 0x23c   :  { %v4892_v55 = vadd.f32 %v5587_v50, %v3969_v5  ;;  %v4900_v28 = vadd.f32 %v5589_v33, %v3969_v5  ;;  %v2332_v54 = vmul.f32 0.2, %v2300_v63  ;;  %v5590_v26 = vld [vmem:[#allocation101_spill] sm:$0xff]  ;;  %v2338_v12 = vmul.f32 0.2, %v4804_v15 }
 0x23d   :  { %v4904_v7 = vadd.f32 %v5590_v26, %v3969_v5  ;;  %v2339_v34 = vmul.f32 0.2, %v4808_v32  ;;  %v2340_v24 = vmul.f32 0.2, %v4812_v53  ;;  %v2341_v6 = vmul.f32 0.2, %v4816_v48 }
 0x23e   :  { %v2364_v47 = vmax.f32 %v2300_v63, %v2332_v54  ;;  %v2342_v16 = vmul.f32 0.2, %v4820_v10  ;;  %v2365_v41 = vmax.f32 %v2301_v37, %v2333_v45  ;;  %v2343_v8 = vmul.f32 0.2, %v4824_v19 }
 0x23f   :  { %v2344_v27 = vmul.f32 0.2, %v4828_v17  ;;  %v2345_v36 = vmul.f32 0.2, %v4832_v43  ;;  %v2366_v11 = vmax.f32 %v2302_v29, %v2334_v39  ;;  %v2346_v46 = vmul.f32 0.2, %v4836_v23 }
 0x240   :  { %2397 = vst [vmem:[#allocation8 + $0x200] sm:$0xff] %v2364_v47  ;;  %v2347_v1 = vmul.f32 0.2, %v4840_v49  ;;  %v2348_v63 = vmul.f32 0.2, %v4844_v57  ;;  %v2367_v31 = vmax.f32 %v4792_v9, %v2335_v25  ;;  %2398 = vst [vmem:[#allocation8 + $0x208] sm:$0xff] %v2365_v41  ;;  %v2368_v22 = vmax.f32 %v4796_v18, %v2336_v0 }
 0x241   :  { %v2349_v2 = vmul.f32 0.2, %v4848_v14  ;;  %v2350_v37 = vmul.f32 0.2, %v4852_v61  ;;  %v2351_v42 = vmul.f32 0.2, %v4856_v13  ;;  %v2369_v40 = vmax.f32 %v4800_v58, %v2337_v20 }
 0x242   :  { %2399 = vst [vmem:[#allocation8 + $0x210] sm:$0xff] %v2366_v11  ;;  %v2352_v29 = vmul.f32 0.2, %v4860_v35  ;;  %v2353_v4 = vmul.f32 0.2, %v4864_v3  ;;  %2400 = vst [vmem:[#allocation8 + $0x218] sm:$0xff] %v2367_v31  ;;  %v2370_v21 = vmax.f32 %v4804_v15, %v2338_v12  ;;  %v2371_v45 = vmax.f32 %v4808_v32, %v2339_v34 }
 0x243   :  { %v2354_v52 = vmul.f32 0.2, %v4868_v59  ;;  %v2355_v9 = vmul.f32 0.2, %v4872_v60  ;;  %v2356_v38 = vmul.f32 0.2, %v4876_v62  ;;  %v2372_v25 = vmax.f32 %v4812_v53, %v2340_v24 }
 0x244   :  { %v2357_v50 = vmul.f32 0.2, %v4880_v44  ;;  %2401 = vst [vmem:[#allocation8 + $0x220] sm:$0xff] %v2368_v22  ;;  %v2358_v18 = vmul.f32 0.2, %v4884_v30  ;;  %2402 = vst [vmem:[#allocation8 + $0x228] sm:$0xff] %v2369_v40  ;;  %v2373_v15 = vmax.f32 %v4816_v48, %v2341_v6  ;;  %v2374_v0 = vmax.f32 %v4820_v10, %v2342_v16 }
 0x245   :  { %v2359_v33 = vmul.f32 0.2, %v4888_v56  ;;  %v2360_v54 = vmul.f32 0.2, %v4892_v55  ;;  %v2361_v58 = vmul.f32 0.2, %v4896_v51  ;;  %v2375_v20 = vmax.f32 %v4824_v19, %v2343_v8 }
 0x246   :  { %v2362_v26 = vmul.f32 0.2, %v4900_v28  ;;  %v2363_v39 = vmul.f32 0.2, %v4904_v7  ;;  %2403 = vst [vmem:[#allocation8 + $0x230] sm:$0xff] %v2370_v21  ;;  %v2376_v12 = vmax.f32 %v4828_v17, %v2344_v27  ;;  %2404 = vst [vmem:[#allocation8 + $0x238] sm:$0xff] %v2371_v45  ;;  %v2377_v32 = vmax.f32 %v4832_v43, %v2345_v36 }
 0x247   :  { %v2378_v34 = vmax.f32 %v4836_v23, %v2346_v46  ;;  %v2379_v47 = vmax.f32 %v4840_v49, %v2347_v1  ;;  %v2380_v41 = vmax.f32 %v4844_v57, %v2348_v63  ;;  %2405 = vst [vmem:[#allocation8 + $0x240] sm:$0xff] %v2372_v25  ;;  %v2381_v53 = vmax.f32 %v4848_v14, %v2349_v2  ;;  %v5596_v6 = vld [vmem:[#allocation47_spill] sm:$0xff]  ;;  %v5598_v36 = vld [vmem:[#allocation56_spill] sm:$0xff]  ;;  %v5599_v46 = vld [vmem:[#allocation58_spill] sm:$0xff] }
 0x248   :  { %v2382_v48 = vmax.f32 %v4852_v61, %v2350_v37  ;;  %v2383_v10 = vmax.f32 %v4856_v13, %v2351_v42  ;;  %v2384_v19 = vmax.f32 %v4860_v35, %v2352_v29  ;;  %2406 = vst [vmem:[#allocation8 + $0x248] sm:$0xff] %v2373_v15  ;;  %2407 = vst [vmem:[#allocation8 + $0x250] sm:$0xff] %v2374_v0  ;;  %v5597_v8 = vld [vmem:[#allocation51_spill] sm:$0xff]  ;;  %v5600_v63 = vld [vmem:[#allocation54_spill] sm:$0xff] }
 0x249   :  { %2408 = vst [vmem:[#allocation8 + $0x258] sm:$0xff] %v2375_v20  ;;  %2409 = vst [vmem:[#allocation8 + $0x260] sm:$0xff] %v2376_v12  ;;  %v2385_v17 = vmax.f32 %v4864_v3, %v2353_v4  ;;  %v2386_v43 = vmax.f32 %v4868_v59, %v2354_v52  ;;  %v2387_v23 = vmax.f32 %v4872_v60, %v2355_v9  ;;  %v5591_v60 = vld [vmem:[#allocation104_spill] sm:$0xff]  ;;  %v5601_v2 = vld [vmem:[#allocation57_spill] sm:$0xff] }
 0x24a   :  { %v2388_v49 = vmax.f32 %v4876_v62, %v2356_v38  ;;  %2410 = vst [vmem:[#allocation8 + $0x268] sm:$0xff] %v2377_v32  ;;  %2411 = vst [vmem:[#allocation8 + $0x270] sm:$0xff] %v2378_v34  ;;  %v2389_v57 = vmax.f32 %v4880_v44, %v2357_v50  ;;  %v2390_v14 = vmax.f32 %v4884_v30, %v2358_v18  ;;  %v5592_v44 = vld [vmem:[#allocation99_spill] sm:$0xff]  ;;  %v5602_v42 = vld [vmem:[#allocation62_spill] sm:$0xff] }
 0x24b   :  { %2412 = vst [vmem:[#allocation8 + $0x278] sm:$0xff] %v2379_v47  ;;  %2413 = vst [vmem:[#allocation8 + $0x280] sm:$0xff] %v2380_v41  ;;  %v2391_v61 = vmax.f32 %v4888_v56, %v2359_v33  ;;  %v2392_v13 = vmax.f32 %v4892_v55, %v2360_v54  ;;  %v2393_v35 = vmax.f32 %v4896_v51, %v2361_v58  ;;  %v5593_v56 = vld [vmem:[#allocation103_spill] sm:$0xff]  ;;  %v5594_v51 = vld [vmem:[#allocation49_spill] sm:$0xff] }
 0x24c   :  { %2414 = vst [vmem:[#allocation8 + $0x288] sm:$0xff] %v2381_v53  ;;  %2415 = vst [vmem:[#allocation8 + $0x290] sm:$0xff] %v2382_v48  ;;  %v2394_v3 = vmax.f32 %v4900_v28, %v2362_v26  ;;  %v2395_v59 = vmax.f32 %v4904_v7, %v2363_v39  ;;  %v2493_v62 = vadd.f32 %v5591_v60, %v3969_v5  ;;  %v5595_v7 = vld [vmem:[#allocation53_spill] sm:$0xff]  ;;  %v5603_v29 = vld [vmem:[#allocation66_spill] sm:$0xff] }
 0x24d   :  { %2416 = vst [vmem:[#allocation8 + $0x298] sm:$0xff] %v2383_v10  ;;  %2417 = vst [vmem:[#allocation8 + $0x2a0] sm:$0xff] %v2384_v19  ;;  %v2494_v30 = vadd.f32 %v5592_v44, %v3969_v5  ;;  %v2495_v55 = vadd.f32 %v5593_v56, %v3969_v5  ;;  %v4972_v28 = vadd.f32 %v5594_v51, %v3969_v5  ;;  %v5604_v52 = vld [vmem:[#allocation60_spill] sm:$0xff]  ;;  %v5606_v50 = vld [vmem:[#allocation70_spill] sm:$0xff] }
 0x24e   :  { %2418 = vst [vmem:[#allocation8 + $0x2a8] sm:$0xff] %v2385_v17  ;;  %2419 = vst [vmem:[#allocation8 + $0x2b0] sm:$0xff] %v2386_v43  ;;  %v4976_v24 = vadd.f32 %v5595_v7, %v3969_v5  ;;  %v4980_v16 = vadd.f32 %v5596_v6, %v3969_v5  ;;  %v4984_v27 = vadd.f32 %v5597_v8, %v3969_v5  ;;  %v5605_v9 = vld [vmem:[#allocation64_spill] sm:$0xff]  ;;  %v5607_v18 = vld [vmem:[#allocation74_spill] sm:$0xff] }
 0x24f   :  { %2420 = vst [vmem:[#allocation8 + $0x2b8] sm:$0xff] %v2387_v23  ;;  %2421 = vst [vmem:[#allocation8 + $0x2c0] sm:$0xff] %v2388_v49  ;;  %v4988_v11 = vadd.f32 %v5598_v36, %v3969_v5  ;;  %v4992_v1 = vadd.f32 %v5599_v46, %v3969_v5  ;;  %v4996_v31 = vadd.f32 %v5600_v63, %v3969_v5  ;;  %v5608_v54 = vld [vmem:[#allocation68_spill] sm:$0xff]  ;;  %v5610_v39 = vld [vmem:[#allocation78_spill] sm:$0xff]  ;;  %v2528_v56 = vmul.f32 0.2, %v4972_v28 }
 0x250   :  { %2422 = vst [vmem:[#allocation8 + $0x2c8] sm:$0xff] %v2389_v57  ;;  %2423 = vst [vmem:[#allocation8 + $0x2d0] sm:$0xff] %v2390_v14  ;;  %v5000_v37 = vadd.f32 %v5601_v2, %v3969_v5  ;;  %v5004_v22 = vadd.f32 %v5602_v42, %v3969_v5  ;;  %v5008_v4 = vadd.f32 %v5603_v29, %v3969_v5  ;;  %v5609_v58 = vld [vmem:[#allocation72_spill] sm:$0xff]  ;;  %v5611_v15 = vld [vmem:[#allocation82_spill] sm:$0xff]  ;;  %v2529_v51 = vmul.f32 0.2, %v4976_v24 }
 0x251   :  { %2424 = vst [vmem:[#allocation8 + $0x2d8] sm:$0xff] %v2391_v61  ;;  %2425 = vst [vmem:[#allocation8 + $0x2e0] sm:$0xff] %v2392_v13  ;;  %v5012_v40 = vadd.f32 %v5604_v52, %v3969_v5  ;;  %v5016_v38 = vadd.f32 %v5605_v9, %v3969_v5  ;;  %v5020_v21 = vadd.f32 %v5606_v50, %v3969_v5  ;;  %v5612_v20 = vld [vmem:[#allocation76_spill] sm:$0xff]  ;;  %v5614_v47 = vld [vmem:[#allocation86_spill] sm:$0xff]  ;;  %v2530_v7 = vmul.f32 0.2, %v4980_v16 }
 0x252   :  { %2426 = vst [vmem:[#allocation8 + $0x2e8] sm:$0xff] %v2393_v35  ;;  %2427 = vst [vmem:[#allocation8 + $0x2f0] sm:$0xff] %v2394_v3  ;;  %v5024_v33 = vadd.f32 %v5607_v18, %v3969_v5  ;;  %v5028_v45 = vadd.f32 %v5608_v54, %v3969_v5  ;;  %v5032_v26 = vadd.f32 %v5609_v58, %v3969_v5  ;;  %v5613_v32 = vld [vmem:[#allocation80_spill] sm:$0xff]  ;;  %v5615_v53 = vld [vmem:[#allocation90_spill] sm:$0xff]  ;;  %v2525_v35 = vmul.f32 0.2, %v2493_v62 }
 0x253   :  { %2428 = vst [vmem:[#allocation8 + $0x2f8] sm:$0xff] %v2395_v59  ;;  %v5036_v25 = vadd.f32 %v5610_v39, %v3969_v5  ;;  %v5040_v0 = vadd.f32 %v5611_v15, %v3969_v5  ;;  %v5044_v12 = vadd.f32 %v5612_v20, %v3969_v5  ;;  %v5048_v34 = vadd.f32 %v5613_v32, %v3969_v5  ;;  %v5616_v10 = vld [vmem:[#allocation84_spill] sm:$0xff]  ;;  %v5618_v23 = vld [vmem:[#allocation94_spill] sm:$0xff] }
 0x254   :  { %v5052_v41 = vadd.f32 %v5614_v47, %v3969_v5  ;;  %v5056_v48 = vadd.f32 %v5615_v53, %v3969_v5  ;;  %v5060_v19 = vadd.f32 %v5616_v10, %v3969_v5  ;;  %v5617_v17 = vld [vmem:[#allocation88_spill] sm:$0xff]  ;;  %v5068_v49 = vadd.f32 %v5618_v23, %v3969_v5  ;;  %v5619_v57 = vld [vmem:[#allocation98_spill] sm:$0xff] }
 0x255   :  { %v5064_v43 = vadd.f32 %v5617_v17, %v3969_v5  ;;  %v5072_v14 = vadd.f32 %v5619_v57, %v3969_v5  ;;  %v5620_v61 = vld [vmem:[#allocation92_spill] sm:$0xff]  ;;  %v2526_v3 = vmul.f32 0.2, %v2494_v30  ;;  %v2527_v59 = vmul.f32 0.2, %v2495_v55 }
 0x256   :  { %v5076_v13 = vadd.f32 %v5620_v61, %v3969_v5  ;;  %v5621_v60 = vld [vmem:[#allocation96_spill] sm:$0xff]  ;;  %v2531_v6 = vmul.f32 0.2, %v4984_v27  ;;  %v2532_v8 = vmul.f32 0.2, %v4988_v11  ;;  %v2557_v46 = vmax.f32 %v2493_v62, %v2525_v35 }
 0x257   :  { %v5080_v44 = vadd.f32 %v5621_v60, %v3969_v5  ;;  %v2533_v36 = vmul.f32 0.2, %v4992_v1  ;;  %v2534_v63 = vmul.f32 0.2, %v4996_v31  ;;  %v2535_v2 = vmul.f32 0.2, %v5000_v37 }
 0x258   :  { %v2536_v5 = vmul.f32 0.2, %v5004_v22  ;;  %v2558_v42 = vmax.f32 %v2494_v30, %v2526_v3  ;;  %v2537_v29 = vmul.f32 0.2, %v5008_v4  ;;  %v2538_v52 = vmul.f32 0.2, %v5012_v40 }
 0x259   :  { %v2539_v9 = vmul.f32 0.2, %v5016_v38  ;;  %v2559_v50 = vmax.f32 %v2495_v55, %v2527_v59  ;;  %2590 = vst [vmem:[#allocation8 + $0x300] sm:$0xff] %v2557_v46  ;;  %v2540_v18 = vmul.f32 0.2, %v5020_v21  ;;  %v2560_v58 = vmax.f32 %v4972_v28, %v2528_v56 }
 0x25a   :  { %v2541_v54 = vmul.f32 0.2, %v5024_v33  ;;  %v2542_v62 = vmul.f32 0.2, %v5028_v45  ;;  %2591 = vst [vmem:[#allocation8 + $0x308] sm:$0xff] %v2558_v42  ;;  %v2561_v20 = vmax.f32 %v4976_v24, %v2529_v51  ;;  %v2562_v53 = vmax.f32 %v4980_v16, %v2530_v7 }
 0x25b   :  { %v2543_v39 = vmul.f32 0.2, %v5032_v26  ;;  %v2544_v30 = vmul.f32 0.2, %v5036_v25  ;;  %v2545_v15 = vmul.f32 0.2, %v5040_v0  ;;  %v2563_v23 = vmax.f32 %v4984_v27, %v2531_v6 }
 0x25c   :  { %2592 = vst [vmem:[#allocation8 + $0x310] sm:$0xff] %v2559_v50  ;;  %v2546_v55 = vmul.f32 0.2, %v5044_v12  ;;  %v2547_v32 = vmul.f32 0.2, %v5048_v34  ;;  %2593 = vst [vmem:[#allocation8 + $0x318] sm:$0xff] %v2560_v58  ;;  %v2564_v35 = vmax.f32 %v4988_v11, %v2532_v8  ;;  %v2565_v3 = vmax.f32 %v4992_v1, %v2533_v36 }
 0x25d   :  { %v2548_v47 = vmul.f32 0.2, %v5052_v41  ;;  %v2549_v28 = vmul.f32 0.2, %v5056_v48  ;;  %v2550_v10 = vmul.f32 0.2, %v5060_v19  ;;  %v2566_v59 = vmax.f32 %v4996_v31, %v2534_v63 }
 0x25e   :  { %v2551_v17 = vmul.f32 0.2, %v5064_v43  ;;  %2594 = vst [vmem:[#allocation8 + $0x320] sm:$0xff] %v2561_v20  ;;  %v2552_v24 = vmul.f32 0.2, %v5068_v49  ;;  %2595 = vst [vmem:[#allocation8 + $0x328] sm:$0xff] %v2562_v53  ;;  %v2567_v60 = vmax.f32 %v5000_v37, %v2535_v2  ;;  %v2568_v27 = vmax.f32 %v5004_v22, %v2536_v5 }
 0x25f   :  { %v2553_v57 = vmul.f32 0.2, %v5072_v14  ;;  %v2555_v61 = vmul.f32 0.2, %v5076_v13  ;;  %v2556_v16 = vmul.f32 0.2, %v5080_v44  ;;  %v2569_v56 = vmax.f32 %v5008_v4, %v2537_v29 }
 0x260   :  { %2596 = vst [vmem:[#allocation8 + $0x330] sm:$0xff] %v2563_v23  ;;  %v2570_v51 = vmax.f32 %v5012_v40, %v2538_v52  ;;  %v2571_v7 = vmax.f32 %v5016_v38, %v2539_v9  ;;  %2597 = vst [vmem:[#allocation8 + $0x338] sm:$0xff] %v2564_v35  ;;  %v2572_v11 = vmax.f32 %v5020_v21, %v2540_v18 }
 0x261   :  { %v2573_v1 = vmax.f32 %v5024_v33, %v2541_v54  ;;  %v2574_v31 = vmax.f32 %v5028_v45, %v2542_v62  ;;  %v2575_v37 = vmax.f32 %v5032_v26, %v2543_v39  ;;  %2598 = vst [vmem:[#allocation8 + $0x340] sm:$0xff] %v2565_v3  ;;  %2599 = vst [vmem:[#allocation8 + $0x348] sm:$0xff] %v2566_v59 }
 0x262   :  { %2600 = vst [vmem:[#allocation8 + $0x350] sm:$0xff] %v2567_v60  ;;  %v2576_v22 = vmax.f32 %v5036_v25, %v2544_v30  ;;  %v2577_v4 = vmax.f32 %v5040_v0, %v2545_v15  ;;  %v2578_v40 = vmax.f32 %v5044_v12, %v2546_v55  ;;  %v2579_v38 = vmax.f32 %v5048_v34, %v2547_v32 }
 0x263   :  { %2601 = vst [vmem:[#allocation8 + $0x358] sm:$0xff] %v2568_v27  ;;  %2602 = vst [vmem:[#allocation8 + $0x360] sm:$0xff] %v2569_v56  ;;  %v2580_v21 = vmax.f32 %v5052_v41, %v2548_v47  ;;  %v2581_v33 = vmax.f32 %v5056_v48, %v2549_v28  ;;  %v2582_v45 = vmax.f32 %v5060_v19, %v2550_v10 }
 0x264   :  { %2603 = vst [vmem:[#allocation8 + $0x368] sm:$0xff] %v2570_v51  ;;  %2604 = vst [vmem:[#allocation8 + $0x370] sm:$0xff] %v2571_v7  ;;  %v2583_v26 = vmax.f32 %v5064_v43, %v2551_v17  ;;  %v2584_v25 = vmax.f32 %v5068_v49, %v2552_v24  ;;  %v2585_v0 = vmax.f32 %v5072_v14, %v2553_v57 }
 0x265   :  { %2605 = vst [vmem:[#allocation8 + $0x378] sm:$0xff] %v2572_v11  ;;  %2606 = vst [vmem:[#allocation8 + $0x380] sm:$0xff] %v2573_v1  ;;  %v2587_v12 = vmax.f32 %v5076_v13, %v2555_v61  ;;  %v2588_v34 = vmax.f32 %v5080_v44, %v2556_v16 }
 0x266   :  { %2607 = vst [vmem:[#allocation8 + $0x388] sm:$0xff] %v2574_v31  ;;  %2608 = vst [vmem:[#allocation8 + $0x390] sm:$0xff] %v2575_v37 }
 0x267   :  { %2609 = vst [vmem:[#allocation8 + $0x398] sm:$0xff] %v2576_v22  ;;  %2610 = vst [vmem:[#allocation8 + $0x3a0] sm:$0xff] %v2577_v4 }
 0x268   :  { %2611 = vst [vmem:[#allocation8 + $0x3a8] sm:$0xff] %v2578_v40  ;;  %2612 = vst [vmem:[#allocation8 + $0x3b0] sm:$0xff] %v2579_v38 }
 0x269   :  { %2613 = vst [vmem:[#allocation8 + $0x3b8] sm:$0xff] %v2580_v21  ;;  %2614 = vst [vmem:[#allocation8 + $0x3c0] sm:$0xff] %v2581_v33 }
 0x26a   :  { %2615 = vst [vmem:[#allocation8 + $0x3c8] sm:$0xff] %v2582_v45  ;;  %2616 = vst [vmem:[#allocation8 + $0x3d0] sm:$0xff] %v2583_v26 }
 0x26b   :  { %2617 = vst [vmem:[#allocation8 + $0x3d8] sm:$0xff] %v2584_v25  ;;  %2618 = vst [vmem:[#allocation8 + $0x3e0] sm:$0xff] %v2585_v0 }
 0x26c   :  { %2620 = vst [vmem:[#allocation8 + $0x3f0] sm:$0xff] %v2587_v12  ;;  %2621 = vst [vmem:[#allocation8 + $0x3f8] sm:$0xff] %v2588_v34 }
 0x26d   :  { %3136 = shalt.err (!%p3133_p6)
}
 0x26e   :  { %s3137_s15 = scalar_lea.hbm %s5160_s3, 16384 }
 0x26f   :  { %p3138_p7 = scmp.ne.s32.totalorder %s5160_s3, %s3137_s15  ;;  %p3141_p8 = scmp.lt.u32.totalorder %s3137_s15, %s5160_s3 }
 0x271   :  { %p3143_p9 = pnand %p3141_p8, %p3138_p7 }
 0x273   :  { %3146 = shalt.err (!%p3143_p9)
}
 0x274   :  { %s3158_s20 = smov 128   ;;  %s3159_s21 = smov 8  }
 0x275   :  { %2633 = dma.vmem_to_hbm [thread:$0]  %s5134_s11, 16384, %s5160_s3, [#allocation5], %s3158_s20, %s3158_s20, %s3159_s21  }
 0x276   :  { %3151 = dma.done.wait [#allocation5], 16384  }
 0x277   :  { %3152 = vsyncadd [#allocation5], 4294950912 }
 0x278   :  { %2637 = vsyncpa [#allocation4], 1 }
 0x279   :  { %2638 = vsyncpa [#allocation7], 1 }
 0x27a   :  { %2639 = vsyncpa [#allocation5], 1 }

</bundles_post_ra>
